<compile_context>
chip_gen: v7x
topology: tpu7x:2x2x1
jax: 0.10.0
libtpu: 0.0.40
codegen_flags: <defaults>
</compile_context>

<pallas_src>
import jax
import jax.numpy as jnp
from jax.experimental import pallas as pl
from jax.experimental.pallas import tpu as pltpu


def _inv_count(c: int) -> float:
    # torch mean() of an empty tensor is NaN; mirror that instead of raising.
    return (1.0 / c) if c > 0 else float("nan")


def _divisors(n: int):
    out, d = set(), 1
    while d * d <= n:
        if n % d == 0:
            out.add(d)
            out.add(n // d)
        d += 1
    return out


def _choose_rows_per_block(n_rows: int, row_bytes: int, budget_bytes: int) -> int:
    """Largest divisor of n_rows that is layout-legal (multiple of 8 or the
    whole axis) and fits the soft VMEM budget."""
    legal = [d for d in _divisors(n_rows) if d % 8 == 0 or d == n_rows]
    fitting = [d for d in legal if d * row_bytes <= budget_bytes]
    if fitting:
        return max(fitting)
    # Best effort: smallest legal tile; caller scales vmem_limit_bytes with it.
    # TODO(synk): add lane-axis (W*D) tiling for volumes where even an 8-row
    # stripe exceeds the VMEM budget (W*D*itemsize*8 > budget).
    return min(legal)


def _is_dual_tensorcore_chip() -> bool:
    """Only v7x-class chips have 2 TensorCores; gate CORE_PARALLEL on it."""
    try:
        kind = jax.devices()[0].device_kind.lower()
    except Exception:
        return False
    return ("v7" in kind) or ("7x" in kind)


def single_grad_loss(field: jax.Array, *,
                     target_block_bytes: int = 8 * 1024 * 1024) -> jax.Array:
    """Pallas implementation of SingleGradLoss.forward -> scalar float32."""
    N, C, H, W, D = field.shape
    NC, WD, R = N * C, W * D, N * C * H

    # Differences never cross N or C -> fold them into the row axis; fuse W
    # and D so the lane (last) axis is W*D wide (lane-dense).
    x = field.reshape(R, WD)

    inv_h = _inv_count(NC * (H - 1) * W * D)
    inv_w = _inv_count(NC * H * (W - 1) * D)
    inv_d = _inv_count(NC * H * W * (D - 1))

    itemsize = field.dtype.itemsize
    RB = _choose_rows_per_block(R, WD * itemsize, target_block_bytes)
    num_blocks = R // RB
    block_bytes = RB * WD * itemsize

    # v7x: split the block axis across the two TensorCores.
    P = 2 if (_is_dual_tensorcore_chip() and hasattr(pltpu, "CORE_PARALLEL")
              and num_blocks >= 2 and num_blocks % 2 == 0) else 1
    S = num_blocks // P

    # ---- precomputed validity masks (applied once, not per element) --------
    r = jnp.arange(R, dtype=jnp.int32)
    # Row r contributes an H diff unless it is the last H row of its (n,c)
    # slice or the last row of its tile (the latter is re-added via the carry).
    mask_h = jnp.where((r % H != H - 1) & (r % RB != RB - 1),
                       1.0, 0.0).astype(jnp.float32).reshape(R, 1)
    l = jnp.arange(WD, dtype=jnp.int32)
    mask_d = jnp.where(l % D != D - 1, 1.0, 0.0).astype(jnp.float32).reshape(1, WD)
    mask_w = jnp.where(l < (W - 1) * D, 1.0, 0.0).astype(jnp.float32).reshape(1, WD)

    def kernel(x_ref, mh_ref, mw_ref, md_ref, out_ref,
               acc_h, acc_w, acc_d, prev_row):
        s = pl.program_id(1)

        @pl.when(s == 0)
        def _init():
            acc_h[...] = jnp.zeros_like(acc_h)
            acc_w[...] = jnp.zeros_like(acc_w)
            acc_d[...] = jnp.zeros_like(acc_d)

        xv = x_ref[...].astype(jnp.float32)                      # (RB, WD)

        def accumulate(acc_ref, v):
            # Per-sublane partial sums only (aligned vreg-row slices + adds);
            # the 8->1 sublane and cross-lane reductions happen in finalize.
            if RB % 8 == 0 and RB // 8 <= 256:
                part = v[0:8, :]
                for g in range(1, RB // 8):
                    part = part + v[8 * g:8 * g + 8, :]
                acc_ref[...] += part
            else:
                acc_ref[0:1, :] += jnp.sum(v, axis=0, keepdims=True)

        # D neighbour: lane l -> l+1.   W neighbour: lane l -> l+D.
        # Accumulated UNMASKED; lane masks are applied once at finalize.
        accumulate(acc_d, jnp.abs(pltpu.roll(xv, WD - 1, 1) - xv))
        accumulate(acc_w, jnp.abs(pltpu.roll(xv, WD - D, 1) - xv))

        # H neighbour: next row (sublane roll) times the precomputed row mask.
        if RB > 1:
            mh = mh_ref[...]                                     # (RB, 1)
            if RB % 8 == 0:
                accumulate(acc_h, jnp.abs(pltpu.roll(xv, RB - 1, 0) - xv) * mh)
            else:
                dh = jnp.abs(xv[1:, :] - xv[:-1, :]) * mh[:-1, :]
                acc_h[0:1, :] += jnp.sum(dh, axis=0, keepdims=True)

        if RB % H != 0:
            # H-tiling: the diff across the tile boundary uses the carried
            # last row of the previous tile (sequential "arbitrary" axis).
            base = (pl.program_id(0) * S + s) * RB

            @pl.when(jnp.logical_and(s > 0, base % H != 0))
            def _carry():
                acc_h[0:1, :] += jnp.abs(xv[0:1, :] - prev_row[...])

            prev_row[...] = xv[RB - 1:RB, :]

        @pl.when(s == pl.num_programs(1) - 1)
        def _finalize():
            sum_h = jnp.sum(acc_h[...])
            sum_w = jnp.sum(acc_w[...] * mw_ref[...])
            sum_d = jnp.sum(acc_d[...] * md_ref[...])
            out_ref[...] = (sum_h * inv_h + sum_w * inv_w
                            + sum_d * inv_d).reshape(1, 1, 1)

    total_elems = N * C * H * W * D
    cost = pl.CostEstimate(
        flops=10 * total_elems,                # 3x(sub+abs+acc) + H mask mul
        transcendentals=0,
        bytes_accessed=total_elems * itemsize + (R + 2 * WD + P) * 4,
    )

    vmem_limit = int(min(max(32 * 1024 * 1024, 2 * block_bytes + (8 << 20)),
                         100 * 1024 * 1024))
    if P > 1:
        dim_sems = (pltpu.CORE_PARALLEL, pltpu.ARBITRARY)
    else:
        dim_sems = ("arbitrary", "arbitrary")

    partials = pl.pallas_call(
        kernel,
        out_shape=jax.ShapeDtypeStruct((P, 1, 1), jnp.float32),
        grid=(P, S),
        in_specs=[
            pl.BlockSpec((RB, WD), lambda p, s: (p * S + s, 0)),   # field rows
            pl.BlockSpec((RB, 1), lambda p, s: (p * S + s, 0)),    # H row mask
            pl.BlockSpec((1, WD), lambda p, s: (0, 0)),            # W lane mask
            pl.BlockSpec((1, WD), lambda p, s: (0, 0)),            # D lane mask
        ],
        out_specs=pl.BlockSpec((1, 1, 1), lambda p, s: (p, 0, 0)),
        scratch_shapes=[
            pltpu.VMEM((8, WD), jnp.float32),   # per-sublane running sum |dH|
            pltpu.VMEM((8, WD), jnp.float32),   # per-sublane running sum |dW|
            pltpu.VMEM((8, WD), jnp.float32),   # per-sublane running sum |dD|
            pltpu.VMEM((1, WD), jnp.float32),   # carried last row of prev tile
        ],
        compiler_params=pltpu.CompilerParams(
            dimension_semantics=dim_sems,
            vmem_limit_bytes=vmem_limit,
        ),
        cost_estimate=cost,
    )(x, mask_h, mask_w, mask_d)

    loss = jnp.sum(partials)

    # H diffs straddling a core-chunk boundary are invisible to the in-kernel
    # carry; patch them with a trivial 2-row correction (only when P > 1).
    for p in range(1, P):
        b = p * S * RB
        if b % H != 0:
            loss = loss + jnp.sum(
                jnp.abs(x[b, :].astype(jnp.float32)
                        - x[b - 1, :].astype(jnp.float32))) * inv_h
    return loss


def single_grad_loss_ref(field: jax.Array) -> jax.Array:
    """Pure-JAX reference identical to the PyTorch forward."""
    f = field.astype(jnp.float32)
    g_h = jnp.abs(f[:, :, 1:, :, :] - f[:, :, :-1, :, :])
    g_w = jnp.abs(f[:, :, :, 1:, :] - f[:, :, :, :-1, :])
    g_d = jnp.abs(f[:, :, :, :, 1:] - f[:, :, :, :, :-1])
    return g_h.mean() + g_w.mean() + g_d.mean()


if __name__ == "__main__":
    # SingleGradLoss has no parameters; only the input field matters.
    key = jax.random.PRNGKey(0)
    N, C, H, W, D = 2, 4, 16, 16, 16
    field = jax.random.normal(key, (N, C, H, W, D), dtype=jnp.float32)

    loss = jax.block_until_ready(single_grad_loss(field))
    ref = jax.block_until_ready(single_grad_loss_ref(field))
    assert jnp.allclose(loss, ref, rtol=1e-5, atol=1e-6), (loss, ref)

    # Extra coverage: asymmetric dims (W != D, non-pow2 D, H not mult. of 8),
    # forced H-tiling (exercises the carried-row path), and bf16 input.
    extra = [
        ((1, 2, 12, 16, 24), jnp.float32, 8 * 1024 * 1024),
        ((1, 1, 32, 8, 16), jnp.float32, 4 * 1024),
        ((2, 4, 16, 16, 16), jnp.bfloat16, 8 * 1024 * 1024),
    ]
    for i, (shape, dtype, blk) in enumerate(extra):
        f = jax.random.normal(jax.random.PRNGKey(i + 1), shape).astype(dtype)
        got = jax.block_until_ready(single_grad_loss(f, target_block_bytes=blk))
        want = jax.block_until_ready(single_grad_loss_ref(f))
        assert jnp.allclose(got, want, rtol=1e-4, atol=1e-5), (shape, dtype, got, want)

    print("KERNEL_OK")
</pallas_src>

<mosaic_0001>
module attributes {stable_mosaic.version = 11 : i64} {
  func.func @kernel(%arg0: i32, %arg1: i32, %arg2: memref<128x256xf32, #tpu.memory_space<vmem>>, %arg3: memref<128x1xf32, #tpu.memory_space<vmem>>, %arg4: memref<1x256xf32, #tpu.memory_space<vmem>>, %arg5: memref<1x256xf32, #tpu.memory_space<vmem>>, %arg6: memref<1x1x1xf32, #tpu.memory_space<vmem>>, %arg7: memref<8x256xf32, #tpu.memory_space<vmem>>, %arg8: memref<8x256xf32, #tpu.memory_space<vmem>>, %arg9: memref<8x256xf32, #tpu.memory_space<vmem>>, %arg10: memref<1x256xf32, #tpu.memory_space<vmem>>) attributes {dimension_semantics = [#tpu.dimension_semantics<arbitrary>, #tpu.dimension_semantics<arbitrary>], iteration_bounds = array<i64: 1, 1>, scalar_prefetch = 0 : i64, scratch_operands = 4 : i64, tpu.core_type = #tpu.core_type<tc>, window_params = [{transform_indices = @transform_0, window_bounds = array<i64: 128, 256>}, {transform_indices = @transform_1, window_bounds = array<i64: 128, 1>}, {pipeline_mode = #tpu.pipeline_mode<synchronous>, transform_indices = @transform_2, window_bounds = array<i64: 1, 256>}, {pipeline_mode = #tpu.pipeline_mode<synchronous>, transform_indices = @transform_3, window_bounds = array<i64: 1, 256>}, {transform_indices = @transform_4, window_bounds = array<i64: 1, 1, 1>}]} {
    %c0_i32 = arith.constant 0 : i32
    %0 = arith.cmpi eq, %arg1, %c0_i32 : i32
    %1 = arith.extui %0 : i1 to i32
    %c0_i32_0 = arith.constant 0 : i32
    %2 = arith.cmpi ne, %1, %c0_i32_0 : i32
    scf.if %2 {
      %cst = arith.constant 0.000000e+00 : f32
      %121 = vector.broadcast %cst : f32 to vector<8x256xf32>
      %c0_18 = arith.constant 0 : index
      %c0_19 = arith.constant 0 : index
      %122 = vector.load %arg7[%c0_18, %c0_19] : memref<8x256xf32, #tpu.memory_space<vmem>>, vector<8x256xf32>
      tpu.vector_store %arg7[%c0_18, %c0_19], %121 {strides = array<i32>} : memref<8x256xf32, #tpu.memory_space<vmem>>, vector<8x256xf32>,
      %cst_20 = arith.constant 0.000000e+00 : f32
      %123 = vector.broadcast %cst_20 : f32 to vector<8x256xf32>
      %c0_21 = arith.constant 0 : index
      %c0_22 = arith.constant 0 : index
      %124 = vector.load %arg8[%c0_21, %c0_22] : memref<8x256xf32, #tpu.memory_space<vmem>>, vector<8x256xf32>
      tpu.vector_store %arg8[%c0_21, %c0_22], %123 {strides = array<i32>} : memref<8x256xf32, #tpu.memory_space<vmem>>, vector<8x256xf32>,
      %cst_23 = arith.constant 0.000000e+00 : f32
      %125 = vector.broadcast %cst_23 : f32 to vector<8x256xf32>
      %c0_24 = arith.constant 0 : index
      %c0_25 = arith.constant 0 : index
      %126 = vector.load %arg9[%c0_24, %c0_25] : memref<8x256xf32, #tpu.memory_space<vmem>>, vector<8x256xf32>
      tpu.vector_store %arg9[%c0_24, %c0_25], %125 {strides = array<i32>} : memref<8x256xf32, #tpu.memory_space<vmem>>, vector<8x256xf32>,
    } else {
    }
    %c0 = arith.constant 0 : index
    %c0_1 = arith.constant 0 : index
    %3 = vector.load %arg2[%c0, %c0_1] : memref<128x256xf32, #tpu.memory_space<vmem>>, vector<128x256xf32>
    %c255_i32 = arith.constant 255 : i32
    %4 = tpu.dynamic_rotate %3 by %c255_i32 dim 1 : vector<128x256xf32>, i32 -> vector<128x256xf32>
    %5 = arith.subf %4, %3 : vector<128x256xf32>
    %6 = math.absf %5 : vector<128x256xf32>
    %7 = vector.extract_strided_slice %6 {offsets = [0, 0], sizes = [8, 256], strides = [1, 1]} : vector<128x256xf32> to vector<8x256xf32>
    %8 = vector.extract_strided_slice %6 {offsets = [8, 0], sizes = [8, 256], strides = [1, 1]} : vector<128x256xf32> to vector<8x256xf32>
    %9 = arith.addf %7, %8 : vector<8x256xf32>
    %10 = vector.extract_strided_slice %6 {offsets = [16, 0], sizes = [8, 256], strides = [1, 1]} : vector<128x256xf32> to vector<8x256xf32>
    %11 = arith.addf %9, %10 : vector<8x256xf32>
    %12 = vector.extract_strided_slice %6 {offsets = [24, 0], sizes = [8, 256], strides = [1, 1]} : vector<128x256xf32> to vector<8x256xf32>
    %13 = arith.addf %11, %12 : vector<8x256xf32>
    %14 = vector.extract_strided_slice %6 {offsets = [32, 0], sizes = [8, 256], strides = [1, 1]} : vector<128x256xf32> to vector<8x256xf32>
    %15 = arith.addf %13, %14 : vector<8x256xf32>
    %16 = vector.extract_strided_slice %6 {offsets = [40, 0], sizes = [8, 256], strides = [1, 1]} : vector<128x256xf32> to vector<8x256xf32>
    %17 = arith.addf %15, %16 : vector<8x256xf32>
    %18 = vector.extract_strided_slice %6 {offsets = [48, 0], sizes = [8, 256], strides = [1, 1]} : vector<128x256xf32> to vector<8x256xf32>
    %19 = arith.addf %17, %18 : vector<8x256xf32>
    %20 = vector.extract_strided_slice %6 {offsets = [56, 0], sizes = [8, 256], strides = [1, 1]} : vector<128x256xf32> to vector<8x256xf32>
    %21 = arith.addf %19, %20 : vector<8x256xf32>
    %22 = vector.extract_strided_slice %6 {offsets = [64, 0], sizes = [8, 256], strides = [1, 1]} : vector<128x256xf32> to vector<8x256xf32>
    %23 = arith.addf %21, %22 : vector<8x256xf32>
    %24 = vector.extract_strided_slice %6 {offsets = [72, 0], sizes = [8, 256], strides = [1, 1]} : vector<128x256xf32> to vector<8x256xf32>
    %25 = arith.addf %23, %24 : vector<8x256xf32>
    %26 = vector.extract_strided_slice %6 {offsets = [80, 0], sizes = [8, 256], strides = [1, 1]} : vector<128x256xf32> to vector<8x256xf32>
    %27 = arith.addf %25, %26 : vector<8x256xf32>
    %28 = vector.extract_strided_slice %6 {offsets = [88, 0], sizes = [8, 256], strides = [1, 1]} : vector<128x256xf32> to vector<8x256xf32>
    %29 = arith.addf %27, %28 : vector<8x256xf32>
    %30 = vector.extract_strided_slice %6 {offsets = [96, 0], sizes = [8, 256], strides = [1, 1]} : vector<128x256xf32> to vector<8x256xf32>
    %31 = arith.addf %29, %30 : vector<8x256xf32>
    %32 = vector.extract_strided_slice %6 {offsets = [104, 0], sizes = [8, 256], strides = [1, 1]} : vector<128x256xf32> to vector<8x256xf32>
    %33 = arith.addf %31, %32 : vector<8x256xf32>
    %34 = vector.extract_strided_slice %6 {offsets = [112, 0], sizes = [8, 256], strides = [1, 1]} : vector<128x256xf32> to vector<8x256xf32>
    %35 = arith.addf %33, %34 : vector<8x256xf32>
    %36 = vector.extract_strided_slice %6 {offsets = [120, 0], sizes = [8, 256], strides = [1, 1]} : vector<128x256xf32> to vector<8x256xf32>
    %37 = arith.addf %35, %36 : vector<8x256xf32>
    %c0_2 = arith.constant 0 : index
    %c0_3 = arith.constant 0 : index
    %38 = vector.load %arg9[%c0_2, %c0_3] : memref<8x256xf32, #tpu.memory_space<vmem>>, vector<8x256xf32>
    %39 = arith.addf %38, %37 : vector<8x256xf32>
    %c0_4 = arith.constant 0 : index
    %c0_5 = arith.constant 0 : index
    %40 = vector.load %arg9[%c0_4, %c0_5] : memref<8x256xf32, #tpu.memory_space<vmem>>, vector<8x256xf32>
    tpu.vector_store %arg9[%c0_4, %c0_5], %39 {strides = array<i32>} : memref<8x256xf32, #tpu.memory_space<vmem>>, vector<8x256xf32>,
    %c240_i32 = arith.constant 240 : i32
    %41 = tpu.dynamic_rotate %3 by %c240_i32 dim 1 : vector<128x256xf32>, i32 -> vector<128x256xf32>
    %42 = arith.subf %41, %3 : vector<128x256xf32>
    %43 = math.absf %42 : vector<128x256xf32>
    %44 = vector.extract_strided_slice %43 {offsets = [0, 0], sizes = [8, 256], strides = [1, 1]} : vector<128x256xf32> to vector<8x256xf32>
    %45 = vector.extract_strided_slice %43 {offsets = [8, 0], sizes = [8, 256], strides = [1, 1]} : vector<128x256xf32> to vector<8x256xf32>
    %46 = arith.addf %44, %45 : vector<8x256xf32>
    %47 = vector.extract_strided_slice %43 {offsets = [16, 0], sizes = [8, 256], strides = [1, 1]} : vector<128x256xf32> to vector<8x256xf32>
    %48 = arith.addf %46, %47 : vector<8x256xf32>
    %49 = vector.extract_strided_slice %43 {offsets = [24, 0], sizes = [8, 256], strides = [1, 1]} : vector<128x256xf32> to vector<8x256xf32>
    %50 = arith.addf %48, %49 : vector<8x256xf32>
    %51 = vector.extract_strided_slice %43 {offsets = [32, 0], sizes = [8, 256], strides = [1, 1]} : vector<128x256xf32> to vector<8x256xf32>
    %52 = arith.addf %50, %51 : vector<8x256xf32>
    %53 = vector.extract_strided_slice %43 {offsets = [40, 0], sizes = [8, 256], strides = [1, 1]} : vector<128x256xf32> to vector<8x256xf32>
    %54 = arith.addf %52, %53 : vector<8x256xf32>
    %55 = vector.extract_strided_slice %43 {offsets = [48, 0], sizes = [8, 256], strides = [1, 1]} : vector<128x256xf32> to vector<8x256xf32>
    %56 = arith.addf %54, %55 : vector<8x256xf32>
    %57 = vector.extract_strided_slice %43 {offsets = [56, 0], sizes = [8, 256], strides = [1, 1]} : vector<128x256xf32> to vector<8x256xf32>
    %58 = arith.addf %56, %57 : vector<8x256xf32>
    %59 = vector.extract_strided_slice %43 {offsets = [64, 0], sizes = [8, 256], strides = [1, 1]} : vector<128x256xf32> to vector<8x256xf32>
    %60 = arith.addf %58, %59 : vector<8x256xf32>
    %61 = vector.extract_strided_slice %43 {offsets = [72, 0], sizes = [8, 256], strides = [1, 1]} : vector<128x256xf32> to vector<8x256xf32>
    %62 = arith.addf %60, %61 : vector<8x256xf32>
    %63 = vector.extract_strided_slice %43 {offsets = [80, 0], sizes = [8, 256], strides = [1, 1]} : vector<128x256xf32> to vector<8x256xf32>
    %64 = arith.addf %62, %63 : vector<8x256xf32>
    %65 = vector.extract_strided_slice %43 {offsets = [88, 0], sizes = [8, 256], strides = [1, 1]} : vector<128x256xf32> to vector<8x256xf32>
    %66 = arith.addf %64, %65 : vector<8x256xf32>
    %67 = vector.extract_strided_slice %43 {offsets = [96, 0], sizes = [8, 256], strides = [1, 1]} : vector<128x256xf32> to vector<8x256xf32>
    %68 = arith.addf %66, %67 : vector<8x256xf32>
    %69 = vector.extract_strided_slice %43 {offsets = [104, 0], sizes = [8, 256], strides = [1, 1]} : vector<128x256xf32> to vector<8x256xf32>
    %70 = arith.addf %68, %69 : vector<8x256xf32>
    %71 = vector.extract_strided_slice %43 {offsets = [112, 0], sizes = [8, 256], strides = [1, 1]} : vector<128x256xf32> to vector<8x256xf32>
    %72 = arith.addf %70, %71 : vector<8x256xf32>
    %73 = vector.extract_strided_slice %43 {offsets = [120, 0], sizes = [8, 256], strides = [1, 1]} : vector<128x256xf32> to vector<8x256xf32>
    %74 = arith.addf %72, %73 : vector<8x256xf32>
    %c0_6 = arith.constant 0 : index
    %c0_7 = arith.constant 0 : index
    %75 = vector.load %arg8[%c0_6, %c0_7] : memref<8x256xf32, #tpu.memory_space<vmem>>, vector<8x256xf32>
    %76 = arith.addf %75, %74 : vector<8x256xf32>
    %c0_8 = arith.constant 0 : index
    %c0_9 = arith.constant 0 : index
    %77 = vector.load %arg8[%c0_8, %c0_9] : memref<8x256xf32, #tpu.memory_space<vmem>>, vector<8x256xf32>
    tpu.vector_store %arg8[%c0_8, %c0_9], %76 {strides = array<i32>} : memref<8x256xf32, #tpu.memory_space<vmem>>, vector<8x256xf32>,
    %c0_10 = arith.constant 0 : index
    %c0_11 = arith.constant 0 : index
    %78 = vector.load %arg3[%c0_10, %c0_11] : memref<128x1xf32, #tpu.memory_space<vmem>>, vector<128x1xf32>
    %c127_i32 = arith.constant 127 : i32
    %79 = tpu.dynamic_rotate %3 by %c127_i32 dim 0 : vector<128x256xf32>, i32 -> vector<128x256xf32>
    %80 = arith.subf %79, %3 : vector<128x256xf32>
    %81 = math.absf %80 : vector<128x256xf32>
    %82 = vector.broadcast %78 : vector<128x1xf32> to vector<128x256xf32>
    %83 = arith.mulf %81, %82 : vector<128x256xf32>
    %84 = vector.extract_strided_slice %83 {offsets = [0, 0], sizes = [8, 256], strides = [1, 1]} : vector<128x256xf32> to vector<8x256xf32>
    %85 = vector.extract_strided_slice %83 {offsets = [8, 0], sizes = [8, 256], strides = [1, 1]} : vector<128x256xf32> to vector<8x256xf32>
    %86 = arith.addf %84, %85 : vector<8x256xf32>
    %87 = vector.extract_strided_slice %83 {offsets = [16, 0], sizes = [8, 256], strides = [1, 1]} : vector<128x256xf32> to vector<8x256xf32>
    %88 = arith.addf %86, %87 : vector<8x256xf32>
    %89 = vector.extract_strided_slice %83 {offsets = [24, 0], sizes = [8, 256], strides = [1, 1]} : vector<128x256xf32> to vector<8x256xf32>
    %90 = arith.addf %88, %89 : vector<8x256xf32>
    %91 = vector.extract_strided_slice %83 {offsets = [32, 0], sizes = [8, 256], strides = [1, 1]} : vector<128x256xf32> to vector<8x256xf32>
    %92 = arith.addf %90, %91 : vector<8x256xf32>
    %93 = vector.extract_strided_slice %83 {offsets = [40, 0], sizes = [8, 256], strides = [1, 1]} : vector<128x256xf32> to vector<8x256xf32>
    %94 = arith.addf %92, %93 : vector<8x256xf32>
    %95 = vector.extract_strided_slice %83 {offsets = [48, 0], sizes = [8, 256], strides = [1, 1]} : vector<128x256xf32> to vector<8x256xf32>
    %96 = arith.addf %94, %95 : vector<8x256xf32>
    %97 = vector.extract_strided_slice %83 {offsets = [56, 0], sizes = [8, 256], strides = [1, 1]} : vector<128x256xf32> to vector<8x256xf32>
    %98 = arith.addf %96, %97 : vector<8x256xf32>
    %99 = vector.extract_strided_slice %83 {offsets = [64, 0], sizes = [8, 256], strides = [1, 1]} : vector<128x256xf32> to vector<8x256xf32>
    %100 = arith.addf %98, %99 : vector<8x256xf32>
    %101 = vector.extract_strided_slice %83 {offsets = [72, 0], sizes = [8, 256], strides = [1, 1]} : vector<128x256xf32> to vector<8x256xf32>
    %102 = arith.addf %100, %101 : vector<8x256xf32>
    %103 = vector.extract_strided_slice %83 {offsets = [80, 0], sizes = [8, 256], strides = [1, 1]} : vector<128x256xf32> to vector<8x256xf32>
    %104 = arith.addf %102, %103 : vector<8x256xf32>
    %105 = vector.extract_strided_slice %83 {offsets = [88, 0], sizes = [8, 256], strides = [1, 1]} : vector<128x256xf32> to vector<8x256xf32>
    %106 = arith.addf %104, %105 : vector<8x256xf32>
    %107 = vector.extract_strided_slice %83 {offsets = [96, 0], sizes = [8, 256], strides = [1, 1]} : vector<128x256xf32> to vector<8x256xf32>
    %108 = arith.addf %106, %107 : vector<8x256xf32>
    %109 = vector.extract_strided_slice %83 {offsets = [104, 0], sizes = [8, 256], strides = [1, 1]} : vector<128x256xf32> to vector<8x256xf32>
    %110 = arith.addf %108, %109 : vector<8x256xf32>
    %111 = vector.extract_strided_slice %83 {offsets = [112, 0], sizes = [8, 256], strides = [1, 1]} : vector<128x256xf32> to vector<8x256xf32>
    %112 = arith.addf %110, %111 : vector<8x256xf32>
    %113 = vector.extract_strided_slice %83 {offsets = [120, 0], sizes = [8, 256], strides = [1, 1]} : vector<128x256xf32> to vector<8x256xf32>
    %114 = arith.addf %112, %113 : vector<8x256xf32>
    %c0_12 = arith.constant 0 : index
    %c0_13 = arith.constant 0 : index
    %115 = vector.load %arg7[%c0_12, %c0_13] : memref<8x256xf32, #tpu.memory_space<vmem>>, vector<8x256xf32>
    %116 = arith.addf %115, %114 : vector<8x256xf32>
    %c0_14 = arith.constant 0 : index
    %c0_15 = arith.constant 0 : index
    %117 = vector.load %arg7[%c0_14, %c0_15] : memref<8x256xf32, #tpu.memory_space<vmem>>, vector<8x256xf32>
    tpu.vector_store %arg7[%c0_14, %c0_15], %116 {strides = array<i32>} : memref<8x256xf32, #tpu.memory_space<vmem>>, vector<8x256xf32>,
    %c0_i32_16 = arith.constant 0 : i32
    %118 = arith.cmpi eq, %arg1, %c0_i32_16 : i32
    %119 = arith.extui %118 : i1 to i32
    %c0_i32_17 = arith.constant 0 : i32
    %120 = arith.cmpi ne, %119, %c0_i32_17 : i32
    scf.if %120 {
      %c0_18 = arith.constant 0 : index
      %c0_19 = arith.constant 0 : index
      %121 = vector.load %arg7[%c0_18, %c0_19] : memref<8x256xf32, #tpu.memory_space<vmem>>, vector<8x256xf32>
      %122 = vector.shape_cast %121 : vector<8x256xf32> to vector<1x8x256xf32>
      %cst = arith.constant dense<0.000000e+00> : vector<1xf32>
      %123 = vector.multi_reduction <add>, %122, %cst [1, 2] : vector<1x8x256xf32> to vector<1xf32>
      %124 = vector.shape_cast %123 : vector<1xf32> to vector<1x1x1xf32>
      %125 = vector.extract %124[0, 0, 0] : f32 from vector<1x1x1xf32>
      %c0_20 = arith.constant 0 : index
      %c0_21 = arith.constant 0 : index
      %126 = vector.load %arg8[%c0_20, %c0_21] : memref<8x256xf32, #tpu.memory_space<vmem>>, vector<8x256xf32>
      %c0_22 = arith.constant 0 : index
      %c0_23 = arith.constant 0 : index
      %127 = vector.load %arg4[%c0_22, %c0_23] : memref<1x256xf32, #tpu.memory_space<vmem>>, vector<1x256xf32>
      %128 = vector.broadcast %127 : vector<1x256xf32> to vector<8x256xf32>
      %129 = arith.mulf %126, %128 : vector<8x256xf32>
      %130 = vector.shape_cast %129 : vector<8x256xf32> to vector<1x8x256xf32>
      %cst_24 = arith.constant dense<0.000000e+00> : vector<1xf32>
      %131 = vector.multi_reduction <add>, %130, %cst_24 [1, 2] : vector<1x8x256xf32> to vector<1xf32>
      %132 = vector.shape_cast %131 : vector<1xf32> to vector<1x1x1xf32>
      %133 = vector.extract %132[0, 0, 0] : f32 from vector<1x1x1xf32>
      %c0_25 = arith.constant 0 : index
      %c0_26 = arith.constant 0 : index
      %134 = vector.load %arg9[%c0_25, %c0_26] : memref<8x256xf32, #tpu.memory_space<vmem>>, vector<8x256xf32>
      %c0_27 = arith.constant 0 : index
      %c0_28 = arith.constant 0 : index
      %135 = vector.load %arg5[%c0_27, %c0_28] : memref<1x256xf32, #tpu.memory_space<vmem>>, vector<1x256xf32>
      %136 = vector.broadcast %135 : vector<1x256xf32> to vector<8x256xf32>
      %137 = arith.mulf %134, %136 : vector<8x256xf32>
      %138 = vector.shape_cast %137 : vector<8x256xf32> to vector<1x8x256xf32>
      %cst_29 = arith.constant dense<0.000000e+00> : vector<1xf32>
      %139 = vector.multi_reduction <add>, %138, %cst_29 [1, 2] : vector<1x8x256xf32> to vector<1xf32>
      %140 = vector.shape_cast %139 : vector<1xf32> to vector<1x1x1xf32>
      %141 = vector.extract %140[0, 0, 0] : f32 from vector<1x1x1xf32>
      %cst_30 = arith.constant 3.2552085E-5 : f32
      %142 = arith.mulf %125, %cst_30 : f32
      %cst_31 = arith.constant 3.2552085E-5 : f32
      %143 = arith.mulf %133, %cst_31 : f32
      %144 = arith.addf %142, %143 : f32
      %cst_32 = arith.constant 3.2552085E-5 : f32
      %145 = arith.mulf %141, %cst_32 : f32
      %146 = arith.addf %144, %145 : f32
      %147 = vector.broadcast %146 : f32 to vector<1x1x1xf32>
      %c0_33 = arith.constant 0 : index
      %c0_34 = arith.constant 0 : index
      %c0_35 = arith.constant 0 : index
      %148 = vector.load %arg6[%c0_33, %c0_34, %c0_35] : memref<1x1x1xf32, #tpu.memory_space<vmem>>, vector<1x1x1xf32>
      tpu.vector_store %arg6[%c0_33, %c0_34, %c0_35], %147 {strides = array<i32>} : memref<1x1x1xf32, #tpu.memory_space<vmem>>, vector<1x1x1xf32>,
    } else {
    }
    return
  }
  func.func @transform_0(%arg0: i32, %arg1: i32) -> (i32, i32) {
    %c1_i32 = arith.constant 1 : i32
    %0 = arith.muli %arg0, %c1_i32 : i32
    %1 = arith.addi %0, %arg1 : i32
    %c0_i32 = arith.constant 0 : i32
    %c0_i32_0 = arith.constant 0 : i32
    return %1, %c0_i32 : i32, i32
  }
  func.func @transform_1(%arg0: i32, %arg1: i32) -> (i32, i32) {
    %c1_i32 = arith.constant 1 : i32
    %0 = arith.muli %arg0, %c1_i32 : i32
    %1 = arith.addi %0, %arg1 : i32
    %c0_i32 = arith.constant 0 : i32
    %c0_i32_0 = arith.constant 0 : i32
    return %1, %c0_i32 : i32, i32
  }
  func.func @transform_2(%arg0: i32, %arg1: i32) -> (i32, i32) {
    %c0_i32 = arith.constant 0 : i32
    %c0_i32_0 = arith.constant 0 : i32
    %c0_i32_1 = arith.constant 0 : i32
    return %c0_i32, %c0_i32_0 : i32, i32
  }
  func.func @transform_3(%arg0: i32, %arg1: i32) -> (i32, i32) {
    %c0_i32 = arith.constant 0 : i32
    %c0_i32_0 = arith.constant 0 : i32
    %c0_i32_1 = arith.constant 0 : i32
    return %c0_i32, %c0_i32_0 : i32, i32
  }
  func.func @transform_4(%arg0: i32, %arg1: i32) -> (i32, i32, i32) {
    %c0_i32 = arith.constant 0 : i32
    %c0_i32_0 = arith.constant 0 : i32
    %c0_i32_1 = arith.constant 0 : i32
    return %arg0, %c0_i32, %c0_i32_0 : i32, i32, i32
  }
}

</mosaic_0001>

<bundles_post_ra>
// kernel: tpu_custom_call.1
= control target key start
LH: loop header
LB: loop body
LE: loop exit
PB: predicated region body
PF: predicated region fallthrough
CT: control target
= control target key end

     0   :  { %9 = vsyncpa [#allocation7], 0  ;;  %s1782_s0 = inlined_call_operand.hbm [shape: f32[128,256], index: 0, kind: input, shape index: {}]   ;;  %s1783_s1 = inlined_call_operand.vmem [shape: f32[128,1], index: 1, kind: input, shape index: {}]   ;;  %s1784_s2 = inlined_call_operand.vmem [shape: f32[1,256], index: 2, kind: input, shape index: {}]   ;;  %s1785_s3 = inlined_call_operand.vmem [shape: f32[1,256], index: 3, kind: input, shape index: {}]   ;;  %s1786_s4 = inlined_call_operand.hbm [shape: f32[1,1,1], index: 4, kind: output, shape index: {}]  }
   0x1   :  { %10 = vsyncpa [#allocation8], 0  ;;  %s953_s15 = smov [#allocation6]   ;;  %s905_s19 = scalar_lea.hbm %s1782_s0, 4096 }
   0x2   :  { %s21_s16 = sshll.u32 %s953_s15, 4  ;;  %p906_p0 = scmp.ne.s32.totalorder %s1782_s0, %s905_s19  ;;  %s22_s16 = int_to_ptr.vmem [resolvable:$true] %s21_s16 }
   0x3   :  { %p909_p1 = scmp.lt.u32.totalorder %s905_s19, %s1782_s0 }
   0x5   :  { %p911_p2 = pnand %p909_p1, %p906_p0 }
   0x7   :  { %914 = shalt.err (!%p911_p2)
}
   0x8   :  { %s915_s24 = scalar_lea.vmem %s22_s16, 4096  ;;  %p920_p4 = scmp.lt.s32.totalorder %s22_s16, %s22_s16 }
   0x9   :  { %p916_p3 = scmp.ne.s32.totalorder %s22_s16, %s915_s24  ;;  %p921_p5 = scmp.lt.s32.totalorder %s915_s24, %s915_s24 }
   0xb   :  { %p922_p6 = por %p921_p5, %p920_p4 }
   0xd   :  { %p923_p7 = pnand %p922_p6, %p916_p3 }
   0xf   :  { %926 = shalt.err (!%p923_p7)
}
  0x10   :  { %s954_s25 = smov 256   ;;  %s955_s26 = smov 16  }
  0x11   :  { %27 = dma.hbm_to_vmem [thread:$0]  %s1782_s0, 4096, %s22_s16, [#allocation7], %s954_s25, %s954_s25, %s955_s26  }
  0x12   :  { %949 = dma.done.wait [#allocation7], 4096  }
  0x13   :  { %950 = vsyncadd [#allocation7], 4294963200  ;;  %v956_v0 = vmov 0   ;;  %v499_v1 = vld [vmem:[%s1783_s1] sm:$0xff]  ;;  %s957_s5 = smov 112   ;;  %v500_v3 = vld [vmem:[%s1783_s1 + $0x8] sm:$0xff]  ;;  %v167_v37 = vlaneseq }
  0x14   :  { %903 = vset.pattern.permute.xlu0 %v956_v0  ;;  %904 = vset.pattern.permute.xlu1 %v956_v0  ;;  %v1000_v2 = vld [vmem:[#allocation6] sm:$0xff]  ;;  %v1007_v4 = vld [vmem:[#allocation6 + $0x10] sm:$0xff]  ;;  %v1011_v5 = vld [vmem:[#allocation6 + $0x8] sm:$0xff]  ;;  %s958_s9 = smov 127   ;;  %s959_s15 = smov [#allocation9]   ;;  %vm867_vm3 = vcmask 0  }
  0x15   :  { %648 = vperm.xlu0 %903, %v499_v1   ;;  %302 = vrot.lane.b32.xlu1 %v1000_v2, %s957_s5  ;;  %v1013_v6 = vld [vmem:[#allocation6 + $0x18] sm:$0xff]  ;;  %v501_v7 = vld [vmem:[%s1783_s1 + $0x10] sm:$0xff]  ;;  %v1028_v8 = vld [vmem:[#allocation6 + $0x20] sm:$0xff]  ;;  %v1176_v39 = vshrl.u32 %v167_v37, 7  ;;  %v1180_v41 = vand.u32 127, %v167_v37  ;;  %v1787_v42 = vrot.slane %v1000_v2, 1 }
  0x16   :  { %v1034_v9 = vld [vmem:[#allocation6 + $0x28] sm:$0xff]  ;;  %v502_v10 = vld [vmem:[%s1783_s1 + $0x18] sm:$0xff]  ;;  %v1045_v11 = vld [vmem:[#allocation6 + $0x30] sm:$0xff]  ;;  %v1788_v43 = vrot.slane %v1011_v5, 1  ;;  %v517_v44 = vrot.slane %v1007_v4, 1  ;;  %v518_v45 = vrot.slane %v1013_v6, 1 }
  0x17   :  { %v1047_v12 = vld [vmem:[#allocation6 + $0x38] sm:$0xff]  ;;  %v503_v13 = vld [vmem:[%s1783_s1 + $0x20] sm:$0xff]  ;;  %v1064_v15 = vld [vmem:[#allocation6 + $0x48] sm:$0xff]  ;;  %vm549_vm0 = vcmp.lt.s32.totalorder %v1176_v39, 7  ;;  %v519_v47 = vrot.slane %v1028_v8, 1  ;;  %v520_v48 = vrot.slane %v1034_v9, 1 }
  0x18   :  { %v1058_v14 = vld [vmem:[#allocation6 + $0x40] sm:$0xff]  ;;  %v504_v16 = vld [vmem:[%s1783_s1 + $0x28] sm:$0xff]  ;;  %v1075_v17 = vld [vmem:[#allocation6 + $0x50] sm:$0xff]  ;;  %vm366_vm1 = vcmp.lt.s32.totalorder %v1180_v41, 112  ;;  %v578_v50 = vsel %vm549_vm0, %v1787_v42, %v517_v44  ;;  %v579_v51 = vsel %vm549_vm0, %v1788_v43, %v518_v45  ;;  %v521_v63 = vrot.slane %v1045_v11, 1  ;;  %s875_s16 = sshll.u32 %s959_s15, 4  ;;  %s876_s16 = int_to_ptr.vmem [resolvable:$true] %s875_s16 }
  0x19   :  { %653 = vperm.xlu0 %903, %v500_v3   ;;  %304 = vrot.lane.b32.xlu1 %v1007_v4, %s957_s5  ;;  %v1077_v18 = vld [vmem:[#allocation6 + $0x58] sm:$0xff]  ;;  %v505_v19 = vld [vmem:[%s1783_s1 + $0x30] sm:$0xff]  ;;  %v1088_v20 = vld [vmem:[#allocation6 + $0x60] sm:$0xff]  ;;  %v576_v54 = vsel %vm549_vm0, %v517_v44, %v519_v47  ;;  %v577_v55 = vsel %vm549_vm0, %v518_v45, %v520_v48  ;;  %v582_v59 = vsub.f32 %v578_v50, %v1000_v2  ;;  %v522_v0 = vrot.slane %v1047_v12, 1  ;;  %s927_s20 = scalar_lea.vmem %s876_s16, 16  ;;  %s931_s21 = scalar_lea.vmem %s876_s16, 32 }
  0x1a   :  { %v1094_v21 = vld [vmem:[#allocation6 + $0x68] sm:$0xff]  ;;  %v506_v22 = vld [vmem:[%s1783_s1 + $0x38] sm:$0xff]  ;;  %v1105_v23 = vld [vmem:[#allocation6 + $0x70] sm:$0xff]  ;;  %v583_v60 = vsub.f32 %v579_v51, %v1011_v5  ;;  %v584_v61 = vsub.f32 %v576_v54, %v1007_v4  ;;  %v585_v62 = vsub.f32 %v577_v55, %v1013_v6  ;;  %vm169_vm2 = vcmp.lt.s32.totalorder %v1180_v41, 127  ;;  %p928_p8 = scmp.ne.s32.totalorder %s876_s16, %s927_s20  ;;  %p932_p9 = scmp.lt.s32.totalorder %s876_s16, %s876_s16 }
  0x1b   :  { %v1107_v24 = vld [vmem:[#allocation6 + $0x78] sm:$0xff]  ;;  %v507_v25 = vld [vmem:[%s1783_s1 + $0x40] sm:$0xff]  ;;  %v1124_v27 = vld [vmem:[#allocation6 + $0x88] sm:$0xff]  ;;  %p933_p10 = scmp.lt.s32.totalorder %s931_s21, %s927_s20 }
  0x1c   :  { %v1118_v26 = vld [vmem:[#allocation6 + $0x80] sm:$0xff]  ;;  %v508_v28 = vld [vmem:[%s1783_s1 + $0x48] sm:$0xff]  ;;  %v1135_v29 = vld [vmem:[#allocation6 + $0x90] sm:$0xff] }
  0x1d   :  { %334 = vrot.lane.b32.xlu0 %v1011_v5, %s957_s5  ;;  %336 = vrot.lane.b32.xlu1 %v1013_v6, %s957_s5  ;;  %v1137_v30 = vld [vmem:[#allocation6 + $0x98] sm:$0xff]  ;;  %v509_v31 = vld [vmem:[%s1783_s1 + $0x50] sm:$0xff]  ;;  %v1148_v32 = vld [vmem:[#allocation6 + $0xa0] sm:$0xff]  ;;  %p934_p11 = por %p933_p10, %p932_p9 }
  0x1e   :  { %1800 = vst [vmem:[#allocation12_spill] sm:$0xff] %v1148_v32  ;;  %v1154_v33 = vld [vmem:[#allocation6 + $0xa8] sm:$0xff]  ;;  %v510_v34 = vld [vmem:[%s1783_s1 + $0x58] sm:$0xff]  ;;  %v1165_v35 = vld [vmem:[#allocation6 + $0xb0] sm:$0xff] }
  0x1f   :  { %1801 = vst [vmem:[#allocation13_spill] sm:$0xff] %v1154_v33  ;;  %v1167_v36 = vld [vmem:[#allocation6 + $0xb8] sm:$0xff]  ;;  %v511_v38 = vld [vmem:[%s1783_s1 + $0x60] sm:$0xff]  ;;  %v1206_v52 = vld [vmem:[#allocation6 + $0xc8] sm:$0xff]  ;;  %p935_p12 = pnand %p934_p11, %p928_p8 }
  0x20   :  { %v1188_v46 = vld [vmem:[#allocation6 + $0xc0] sm:$0xff]  ;;  %v512_v53 = vld [vmem:[%s1783_s1 + $0x68] sm:$0xff]  ;;  %v513_v51 = vld [vmem:[%s1783_s1 + $0x70] sm:$0xff] }
  0x21   :  { %658 = vperm.xlu0 %903, %v501_v7   ;;  %103 = vrot.lane.b32.xlu1 %v1000_v2, %s958_s9  ;;  %1802 = vst [vmem:[#allocation14_spill] sm:$0xff] %v1188_v46  ;;  %v614_v7 = vand.u32 2147483647, %v582_v59 }
  0x25   :  { %105 = vrot.lane.b32.xlu0 %v1007_v4, %s958_s9  ;;  %135 = vrot.lane.b32.xlu1 %v1011_v5, %s958_s9 }
  0x29   :  { %137 = vrot.lane.b32.xlu0 %v1013_v6, %s958_s9  ;;  %306 = vrot.lane.b32.xlu1 %v1028_v8, %s957_s5 }
  0x2d   :  { %338 = vrot.lane.b32.xlu0 %v1034_v9, %s957_s5  ;;  %663 = vperm.xlu1 %904, %v502_v10   ;;  %v615_v10 = vand.u32 2147483647, %v583_v60 }
  0x31   :  { %107 = vrot.lane.b32.xlu0 %v1028_v8, %s958_s9  ;;  %139 = vrot.lane.b32.xlu1 %v1034_v9, %s958_s9 }
  0x35   :  { %308 = vrot.lane.b32.xlu0 %v1045_v11, %s957_s5  ;;  %340 = vrot.lane.b32.xlu1 %v1047_v12, %s957_s5 }
  0x39   :  { %668 = vperm.xlu0 %903, %v503_v13   ;;  %109 = vrot.lane.b32.xlu1 %v1045_v11, %s958_s9  ;;  %v616_v13 = vand.u32 2147483647, %v584_v61 }
  0x3d   :  { %141 = vrot.lane.b32.xlu0 %v1047_v12, %s958_s9  ;;  %310 = vrot.lane.b32.xlu1 %v1058_v14, %s957_s5 }
  0x41   :  { %342 = vrot.lane.b32.xlu0 %v1064_v15, %s957_s5  ;;  %673 = vperm.xlu1 %904, %v504_v16   ;;  %v617_v16 = vand.u32 2147483647, %v585_v62 }
  0x45   :  { %111 = vrot.lane.b32.xlu0 %v1058_v14, %s958_s9  ;;  %143 = vrot.lane.b32.xlu1 %v1064_v15, %s958_s9 }
  0x49   :  { %312 = vrot.lane.b32.xlu0 %v1075_v17, %s957_s5  ;;  %344 = vrot.lane.b32.xlu1 %v1077_v18, %s957_s5 }
  0x4d   :  { %678 = vperm.xlu0 %903, %v505_v19   ;;  %113 = vrot.lane.b32.xlu1 %v1075_v17, %s958_s9  ;;  %v574_v19 = vsel %vm549_vm0, %v519_v47, %v521_v63 }
  0x4e   :  { %v586_v44 = vsub.f32 %v574_v19, %v1028_v8 }
  0x50   :  { %v618_v62 = vand.u32 2147483647, %v586_v44 }
  0x51   :  { %145 = vrot.lane.b32.xlu0 %v1077_v18, %s958_s9  ;;  %314 = vrot.lane.b32.xlu1 %v1088_v20, %s957_s5 }
  0x55   :  { %346 = vrot.lane.b32.xlu0 %v1094_v21, %s957_s5  ;;  %683 = vperm.xlu1 %904, %v506_v22   ;;  %v575_v22 = vsel %vm549_vm0, %v520_v48, %v522_v0 }
  0x56   :  { %v587_v45 = vsub.f32 %v575_v22, %v1034_v9 }
  0x59   :  { %115 = vrot.lane.b32.xlu0 %v1088_v20, %s958_s9  ;;  %147 = vrot.lane.b32.xlu1 %v1094_v21, %s958_s9 }
  0x5d   :  { %316 = vrot.lane.b32.xlu0 %v1105_v23, %s957_s5  ;;  %348 = vrot.lane.b32.xlu1 %v1107_v24, %s957_s5 }
  0x61   :  { %688 = vperm.xlu0 %903, %v507_v25   ;;  %117 = vrot.lane.b32.xlu1 %v1105_v23, %s958_s9  ;;  %v1236_v25 = vld [vmem:[#allocation6 + $0xd0] sm:$0xff] }
  0x65   :  { %149 = vrot.lane.b32.xlu0 %v1107_v24, %s958_s9  ;;  %318 = vrot.lane.b32.xlu1 %v1118_v26, %s957_s5 }
  0x69   :  { %350 = vrot.lane.b32.xlu0 %v1124_v27, %s957_s5  ;;  %693 = vperm.xlu1 %904, %v508_v28  }
  0x6d   :  { %119 = vrot.lane.b32.xlu0 %v1118_v26, %s958_s9  ;;  %151 = vrot.lane.b32.xlu1 %v1124_v27, %s958_s9 }
  0x71   :  { %320 = vrot.lane.b32.xlu0 %v1135_v29, %s957_s5  ;;  %352 = vrot.lane.b32.xlu1 %v1137_v30, %s957_s5 }
  0x75   :  { %698 = vperm.xlu0 %903, %v509_v31   ;;  %121 = vrot.lane.b32.xlu1 %v1135_v29, %s958_s9  ;;  %v1238_v31 = vld [vmem:[#allocation6 + $0xd8] sm:$0xff] }
  0x79   :  { %153 = vrot.lane.b32.xlu0 %v1137_v30, %s958_s9  ;;  %322 = vrot.lane.b32.xlu1 %v1148_v32, %s957_s5 }
  0x7d   :  { %354 = vrot.lane.b32.xlu0 %v1154_v33, %s957_s5  ;;  %703 = vperm.xlu1 %904, %v510_v34  }
  0x81   :  { %123 = vrot.lane.b32.xlu0 %v1148_v32, %s958_s9  ;;  %155 = vrot.lane.b32.xlu1 %v1154_v33, %s958_s9 }
  0x85   :  { %324 = vrot.lane.b32.xlu0 %v1165_v35, %s957_s5  ;;  %356 = vrot.lane.b32.xlu1 %v1167_v36, %s957_s5 }
  0x87   :  { %v1178_v40 = vpop.permute.xlu1 %302 }
  0x89   :  { %708 = vperm.xlu0 %903, %v511_v38   ;;  %125 = vrot.lane.b32.xlu1 %v1165_v35, %s958_s9 }
  0x8b   :  { %v305_v49 = vpop.permute.xlu1 %304 }
  0x8d   :  { %157 = vrot.lane.b32.xlu0 %v1167_v36, %s958_s9  ;;  %326 = vrot.lane.b32.xlu1 %v1188_v46, %s957_s5 }
  0x8f   :  { %v337_v56 = vpop.permute.xlu1 %336 }
  0x90   :  { %v368_v57 = vsel %vm366_vm1, %v305_v49, %v337_v56  ;;  %v384_v58 = vsel %vm366_vm1, %v337_v56, %v305_v49 }
  0x91   :  { %358 = vrot.lane.b32.xlu0 %v1206_v52, %s957_s5  ;;  %713 = vperm.xlu1 %904, %v512_v53   ;;  %v401_v53 = vsub.f32 %v368_v57, %v1007_v4  ;;  %v402_v56 = vsub.f32 %v384_v58, %v1013_v6  ;;  %v523_v58 = vrot.slane %v1058_v14, 1 }
  0x93   :  { %v104_v1 = vpop.permute.xlu1 %103 }
  0x94   :  { %v649_v3 = vpop.permute.xlu0 %648 }
  0x95   :  { %127 = vrot.lane.b32.xlu0 %v1188_v46, %s958_s9  ;;  %159 = vrot.lane.b32.xlu1 %v1206_v52, %s958_s9  ;;  %v726_v47 = vmul.f32 %v649_v3, %v614_v7  ;;  %v727_v48 = vmul.f32 %v649_v3, %v615_v10  ;;  %v524_v7 = vrot.slane %v1064_v15, 1  ;;  %v433_v10 = vand.u32 2147483647, %v401_v53  ;;  %v514_v53 = vld [vmem:[%s1783_s1 + $0x78] sm:$0xff] }
  0x97   :  { %v136_v28 = vpop.permute.xlu1 %135 }
  0x98   :  { %v1242_v34 = vsel %vm169_vm2, %v104_v1, %v136_v28  ;;  %v1246_v37 = vsel %vm169_vm2, %v136_v28, %v104_v1  ;;  %v654_v38 = vpop.permute.xlu0 %653  ;;  %v619_v1 = vand.u32 2147483647, %v587_v45 }
  0x99   :  { %v728_v49 = vmul.f32 %v654_v38, %v616_v13  ;;  %v729_v50 = vmul.f32 %v654_v38, %v617_v16  ;;  %328 = vrot.lane.b32.xlu0 %v1236_v25, %s957_s5  ;;  %360 = vrot.lane.b32.xlu1 %v1238_v31, %s957_s5  ;;  %v1271_v13 = vld [vmem:[#allocation6 + $0xe0] sm:$0xff]  ;;  %v434_v16 = vand.u32 2147483647, %v402_v56 }
  0x9b   :  { %v758_v54 = vadd.f32 %v728_v49, %v726_v47  ;;  %v759_v55 = vadd.f32 %v729_v50, %v727_v48  ;;  %v572_v47 = vsel %vm549_vm0, %v521_v63, %v523_v58  ;;  %v573_v48 = vsel %vm549_vm0, %v522_v0, %v524_v7  ;;  %v1281_v49 = vld [vmem:[#allocation6 + $0xe8] sm:$0xff] }
  0x9c   :  { %v335_v59 = vpop.permute.xlu0 %334  ;;  %v202_v63 = vsub.f32 %v1242_v34, %v1000_v2  ;;  %v525_v0 = vrot.slane %v1075_v17, 1 }
  0x9d   :  { %v367_v60 = vsel %vm366_vm1, %v1178_v40, %v335_v59  ;;  %v383_v61 = vsel %vm366_vm1, %v335_v59, %v1178_v40  ;;  %718 = vperm.xlu0 %903, %v513_v51   ;;  %129 = vrot.lane.b32.xlu1 %v1236_v25, %s958_s9  ;;  %v588_v59 = vsub.f32 %v572_v47, %v1045_v11 }
  0x9e   :  { %v399_v3 = vsub.f32 %v367_v60, %v1000_v2  ;;  %v400_v57 = vsub.f32 %v383_v61, %v1011_v5  ;;  %v589_v60 = vsub.f32 %v573_v48, %v1047_v12 }
  0xa0   :  { %v431_v19 = vand.u32 2147483647, %v399_v3  ;;  %v432_v40 = vand.u32 2147483647, %v400_v57  ;;  %v659_v22 = vpop.permute.xlu0 %658  ;;  %v620_v57 = vand.u32 2147483647, %v588_v59 }
  0xa1   :  { %v730_v28 = vmul.f32 %v659_v22, %v618_v62  ;;  %v731_v38 = vmul.f32 %v659_v22, %v619_v1  ;;  %161 = vrot.lane.b32.xlu0 %v1238_v31, %s958_s9  ;;  %330 = vrot.lane.b32.xlu1 %v1271_v13, %s957_s5  ;;  %v526_v62 = vrot.slane %v1077_v18, 1  ;;  %v1310_v22 = vld [vmem:[#allocation6 + $0xf8] sm:$0xff] }
  0xa2   :  { %v463_v44 = vadd.f32 %v433_v10, %v431_v19  ;;  %v464_v45 = vadd.f32 %v434_v16, %v432_v40  ;;  %v621_v10 = vand.u32 2147483647, %v589_v60  ;;  %v234_v19 = vand.u32 2147483647, %v202_v63  ;;  %1803 = vst [vmem:[#allocation15_spill] sm:$0xff] %v1310_v22 }
  0xa3   :  { %v760_v50 = vadd.f32 %v758_v54, %v730_v28  ;;  %v761_v51 = vadd.f32 %v759_v55, %v731_v38  ;;  %v203_v54 = vsub.f32 %v1246_v37, %v1011_v5  ;;  %v307_v55 = vpop.permute.xlu1 %306  ;;  %v1306_v37 = vld [vmem:[#allocation6 + $0xf0] sm:$0xff]  ;;  %v570_v40 = vsel %vm549_vm0, %v523_v58, %v525_v0 }
  0xa4   :  { %v106_v56 = vpop.permute.xlu0 %105 }
  0xa5   :  { %362 = vrot.lane.b32.xlu0 %v1281_v49, %s957_s5  ;;  %723 = vperm.xlu1 %904, %v514_v53   ;;  %v235_v28 = vand.u32 2147483647, %v203_v54 }
  0xa8   :  { %v138_v61 = vpop.permute.xlu0 %137 }
  0xa9   :  { %v171_v1 = vsel %vm169_vm2, %v106_v56, %v138_v61  ;;  %v187_v3 = vsel %vm169_vm2, %v138_v61, %v106_v56  ;;  %131 = vrot.lane.b32.xlu0 %v1271_v13, %s958_s9  ;;  %163 = vrot.lane.b32.xlu1 %v1281_v49, %s958_s9 }
  0xaa   :  { %v204_v34 = vsub.f32 %v171_v1, %v1007_v4  ;;  %v205_v16 = vsub.f32 %v187_v3, %v1013_v6  ;;  %v571_v4 = vsel %vm549_vm0, %v524_v7, %v526_v62  ;;  %v590_v3 = vsub.f32 %v570_v40, %v1058_v14 }
  0xac   :  { %v236_v38 = vand.u32 2147483647, %v204_v34  ;;  %v237_v47 = vand.u32 2147483647, %v205_v16  ;;  %v339_v48 = vpop.permute.xlu0 %338  ;;  %v664_v53 = vpop.permute.xlu1 %663  ;;  %v591_v16 = vsub.f32 %v571_v4, %v1064_v15 }
  0xad   :  { %v369_v6 = vsel %vm366_vm1, %v307_v55, %v339_v48  ;;  %v385_v56 = vsel %vm366_vm1, %v339_v48, %v307_v55  ;;  %v732_v59 = vmul.f32 %v664_v53, %v620_v57  ;;  %v733_v60 = vmul.f32 %v664_v53, %v621_v10  ;;  %332 = vrot.lane.b32.xlu0 %v1306_v37, %s957_s5 }
  0xae   :  { %v266_v58 = vadd.f32 %v236_v38, %v234_v19  ;;  %v267_v63 = vadd.f32 %v237_v47, %v235_v28  ;;  %v403_v54 = vsub.f32 %v369_v6, %v1028_v8  ;;  %v404_v61 = vsub.f32 %v385_v56, %v1034_v9  ;;  %364 = vrot.lane.b32.xlu1 %v1310_v22, %s957_s5 }
  0xaf   :  { %v762_v7 = vadd.f32 %v760_v50, %v732_v59  ;;  %v763_v1 = vadd.f32 %v761_v51, %v733_v60  ;;  %v527_v50 = vrot.slane %v1088_v20, 1  ;;  %v528_v51 = vrot.slane %v1094_v21, 1 }
  0xb0   :  { %v435_v34 = vand.u32 2147483647, %v403_v54  ;;  %v436_v55 = vand.u32 2147483647, %v404_v61  ;;  %v108_v57 = vpop.permute.xlu0 %107  ;;  %v140_v10 = vpop.permute.xlu1 %139  ;;  %v622_v53 = vand.u32 2147483647, %v590_v3 }
  0xb1   :  { %v172_v19 = vsel %vm169_vm2, %v108_v57, %v140_v10  ;;  %v188_v28 = vsel %vm169_vm2, %v140_v10, %v108_v57  ;;  %133 = vrot.lane.b32.xlu0 %v1306_v37, %s958_s9  ;;  %v623_v60 = vand.u32 2147483647, %v591_v16 }
  0xb2   :  { %v465_v40 = vadd.f32 %v463_v44, %v435_v34  ;;  %v466_v38 = vadd.f32 %v464_v45, %v436_v55  ;;  %v206_v47 = vsub.f32 %v172_v19, %v1028_v8  ;;  %v207_v48 = vsub.f32 %v188_v28, %v1034_v9  ;;  %165 = vrot.lane.b32.xlu1 %v1310_v22, %s958_s9 }
  0xb3   :  { %v568_v8 = vsel %vm549_vm0, %v525_v0, %v527_v50  ;;  %v569_v9 = vsel %vm549_vm0, %v526_v62, %v528_v51 }
  0xb4   :  { %v238_v4 = vand.u32 2147483647, %v206_v47  ;;  %v239_v6 = vand.u32 2147483647, %v207_v48  ;;  %v309_v56 = vpop.permute.xlu0 %308  ;;  %v341_v59 = vpop.permute.xlu1 %340  ;;  %v592_v47 = vsub.f32 %v568_v8, %v1075_v17  ;;  %v593_v48 = vsub.f32 %v569_v9, %v1077_v18 }
  0xb5   :  { %v370_v54 = vsel %vm366_vm1, %v309_v56, %v341_v59  ;;  %v386_v44 = vsel %vm366_vm1, %v341_v59, %v309_v56 }
  0xb6   :  { %v268_v45 = vadd.f32 %v266_v58, %v238_v4  ;;  %v269_v61 = vadd.f32 %v267_v63, %v239_v6  ;;  %v405_v3 = vsub.f32 %v370_v54, %v1045_v11  ;;  %v406_v34 = vsub.f32 %v386_v44, %v1047_v12 }
  0xb7   :  { %v529_v4 = vrot.slane %v1105_v23, 1  ;;  %v530_v6 = vrot.slane %v1107_v24, 1  ;;  %v625_v44 = vand.u32 2147483647, %v593_v48 }
  0xb8   :  { %v437_v55 = vand.u32 2147483647, %v405_v3  ;;  %v438_v57 = vand.u32 2147483647, %v406_v34  ;;  %v669_v10 = vpop.permute.xlu0 %668  ;;  %v110_v16 = vpop.permute.xlu1 %109 }
  0xb9   :  { %v734_v19 = vmul.f32 %v669_v10, %v622_v53  ;;  %v735_v28 = vmul.f32 %v669_v10, %v623_v60  ;;  %v624_v60 = vand.u32 2147483647, %v592_v47  ;;  %v566_v3 = vsel %vm549_vm0, %v527_v50, %v529_v4 }
  0xba   :  { %v467_v0 = vadd.f32 %v465_v40, %v437_v55  ;;  %v468_v56 = vadd.f32 %v466_v38, %v438_v57  ;;  %v567_v34 = vsel %vm549_vm0, %v528_v51, %v530_v6  ;;  %v594_v50 = vsub.f32 %v566_v3, %v1088_v20 }
  0xbb   :  { %v764_v59 = vadd.f32 %v762_v7, %v734_v19  ;;  %v765_v62 = vadd.f32 %v763_v1, %v735_v28 }
  0xbc   :  { %v142_v58 = vpop.permute.xlu0 %141  ;;  %v311_v63 = vpop.permute.xlu1 %310 }
  0xbd   :  { %v173_v54 = vsel %vm169_vm2, %v110_v16, %v142_v58  ;;  %v189_v53 = vsel %vm169_vm2, %v142_v58, %v110_v16 }
  0xbe   :  { %v208_v8 = vsub.f32 %v173_v54, %v1045_v11  ;;  %v209_v40 = vsub.f32 %v189_v53, %v1047_v12 }
  0xc0   :  { %v240_v7 = vand.u32 2147483647, %v208_v8  ;;  %v241_v1 = vand.u32 2147483647, %v209_v40  ;;  %v343_v38 = vpop.permute.xlu0 %342  ;;  %v674_v9 = vpop.permute.xlu1 %673  ;;  %v595_v8 = vsub.f32 %v567_v34, %v1094_v21 }
  0xc1   :  { %v371_v55 = vsel %vm366_vm1, %v311_v63, %v343_v38  ;;  %v387_v57 = vsel %vm366_vm1, %v343_v38, %v311_v63  ;;  %v736_v10 = vmul.f32 %v674_v9, %v624_v60  ;;  %v737_v11 = vmul.f32 %v674_v9, %v625_v44 }
  0xc2   :  { %v270_v16 = vadd.f32 %v268_v45, %v240_v7  ;;  %v271_v12 = vadd.f32 %v269_v61, %v241_v1  ;;  %v407_v19 = vsub.f32 %v371_v55, %v1058_v14  ;;  %v408_v28 = vsub.f32 %v387_v57, %v1064_v15 }
  0xc3   :  { %v766_v47 = vadd.f32 %v764_v59, %v736_v10  ;;  %v767_v48 = vadd.f32 %v765_v62, %v737_v11  ;;  %v531_v61 = vrot.slane %v1118_v26, 1  ;;  %v532_v60 = vrot.slane %v1124_v27, 1 }
  0xc4   :  { %v439_v58 = vand.u32 2147483647, %v407_v19  ;;  %v440_v51 = vand.u32 2147483647, %v408_v28  ;;  %v112_v54 = vpop.permute.xlu0 %111  ;;  %v144_v53 = vpop.permute.xlu1 %143  ;;  %v626_v7 = vand.u32 2147483647, %v594_v50 }
  0xc5   :  { %v174_v63 = vsel %vm169_vm2, %v112_v54, %v144_v53  ;;  %v190_v45 = vsel %vm169_vm2, %v144_v53, %v112_v54  ;;  %v627_v34 = vand.u32 2147483647, %v595_v8 }
  0xc6   :  { %v469_v59 = vadd.f32 %v467_v0, %v439_v58  ;;  %v470_v62 = vadd.f32 %v468_v56, %v440_v51  ;;  %v210_v44 = vsub.f32 %v174_v63, %v1058_v14  ;;  %v211_v40 = vsub.f32 %v190_v45, %v1064_v15 }
  0xc7   :  { %v564_v0 = vsel %vm549_vm0, %v529_v4, %v531_v61  ;;  %v565_v14 = vsel %vm549_vm0, %v530_v6, %v532_v60 }
  0xc8   :  { %v242_v1 = vand.u32 2147483647, %v210_v44  ;;  %v243_v38 = vand.u32 2147483647, %v211_v40  ;;  %v313_v9 = vpop.permute.xlu0 %312  ;;  %v345_v3 = vpop.permute.xlu1 %344  ;;  %v596_v53 = vsub.f32 %v564_v0, %v1105_v23  ;;  %v597_v4 = vsub.f32 %v565_v14, %v1107_v24 }
  0xc9   :  { %v372_v55 = vsel %vm366_vm1, %v313_v9, %v345_v3  ;;  %v388_v57 = vsel %vm366_vm1, %v345_v3, %v313_v9 }
  0xca   :  { %v272_v15 = vadd.f32 %v270_v16, %v242_v1  ;;  %v273_v56 = vadd.f32 %v271_v12, %v243_v38  ;;  %v409_v10 = vsub.f32 %v372_v55, %v1075_v17  ;;  %v410_v11 = vsub.f32 %v388_v57, %v1077_v18 }
  0xcb   :  { %v628_v1 = vand.u32 2147483647, %v596_v53  ;;  %v629_v38 = vand.u32 2147483647, %v597_v4 }
  0xcc   :  { %v441_v19 = vand.u32 2147483647, %v409_v10  ;;  %v442_v28 = vand.u32 2147483647, %v410_v11  ;;  %v679_v50 = vpop.permute.xlu0 %678  ;;  %v114_v58 = vpop.permute.xlu1 %113 }
  0xcd   :  { %v738_v51 = vmul.f32 %v679_v50, %v626_v7  ;;  %v739_v54 = vmul.f32 %v679_v50, %v627_v34 }
  0xce   :  { %v471_v8 = vadd.f32 %v469_v59, %v441_v19  ;;  %v472_v63 = vadd.f32 %v470_v62, %v442_v28 }
  0xcf   :  { %v768_v45 = vadd.f32 %v766_v47, %v738_v51  ;;  %v769_v6 = vadd.f32 %v767_v48, %v739_v54 }
  0xd0   :  { %v146_v16 = vpop.permute.xlu0 %145  ;;  %v315_v12 = vpop.permute.xlu1 %314 }
  0xd1   :  { %v175_v44 = vsel %vm169_vm2, %v114_v58, %v146_v16  ;;  %v191_v40 = vsel %vm169_vm2, %v146_v16, %v114_v58 }
  0xd2   :  { %v212_v7 = vsub.f32 %v175_v44, %v1075_v17  ;;  %v213_v9 = vsub.f32 %v191_v40, %v1077_v18 }
  0xd4   :  { %v244_v3 = vand.u32 2147483647, %v212_v7  ;;  %v245_v34 = vand.u32 2147483647, %v213_v9  ;;  %v347_v59 = vpop.permute.xlu0 %346  ;;  %v684_v62 = vpop.permute.xlu1 %683 }
  0xd5   :  { %v373_v47 = vsel %vm366_vm1, %v315_v12, %v347_v59  ;;  %v389_v48 = vsel %vm366_vm1, %v347_v59, %v315_v12  ;;  %v740_v55 = vmul.f32 %v684_v62, %v628_v1  ;;  %v741_v57 = vmul.f32 %v684_v62, %v629_v38 }
  0xd6   :  { %v274_v0 = vadd.f32 %v272_v15, %v244_v3  ;;  %v275_v14 = vadd.f32 %v273_v56, %v245_v34  ;;  %v411_v10 = vsub.f32 %v373_v47, %v1088_v20  ;;  %v412_v17 = vsub.f32 %v389_v48, %v1094_v21 }
  0xd7   :  { %v1406_v11 = vadd.f32 %v768_v45, %v740_v55  ;;  %v1408_v18 = vadd.f32 %v769_v6, %v741_v57 }
  0xd8   :  { %v443_v19 = vand.u32 2147483647, %v411_v10  ;;  %v444_v28 = vand.u32 2147483647, %v412_v17  ;;  %v116_v50 = vpop.permute.xlu0 %115  ;;  %v148_v58 = vpop.permute.xlu1 %147 }
  0xd9   :  { %v176_v51 = vsel %vm169_vm2, %v116_v50, %v148_v58  ;;  %v192_v54 = vsel %vm169_vm2, %v148_v58, %v116_v50 }
  0xda   :  { %v473_v15 = vadd.f32 %v471_v8, %v443_v19  ;;  %v474_v56 = vadd.f32 %v472_v63, %v444_v28  ;;  %v214_v53 = vsub.f32 %v176_v51, %v1088_v20  ;;  %v215_v4 = vsub.f32 %v192_v54, %v1094_v21 }
  0xdc   :  { %v246_v45 = vand.u32 2147483647, %v214_v53  ;;  %v247_v16 = vand.u32 2147483647, %v215_v4  ;;  %v317_v6 = vpop.permute.xlu0 %316  ;;  %v349_v12 = vpop.permute.xlu1 %348  ;;  %v533_v53 = vrot.slane %v1135_v29, 1  ;;  %v534_v4 = vrot.slane %v1137_v30, 1 }
  0xdd   :  { %v374_v44 = vsel %vm366_vm1, %v317_v6, %v349_v12  ;;  %v390_v40 = vsel %vm366_vm1, %v349_v12, %v317_v6  ;;  %v537_v6 = vrot.slane %v1165_v35, 1 }
  0xde   :  { %v276_v1 = vadd.f32 %v274_v0, %v246_v45  ;;  %v277_v38 = vadd.f32 %v275_v14, %v247_v16  ;;  %v413_v7 = vsub.f32 %v374_v44, %v1105_v23  ;;  %v414_v8 = vsub.f32 %v390_v40, %v1107_v24 }
  0xdf   :  { %v535_v45 = vrot.slane %v1148_v32, 1  ;;  %v536_v16 = vrot.slane %v1154_v33, 1  ;;  %v562_v40 = vsel %vm549_vm0, %v531_v61, %v533_v53 }
  0xe0   :  { %v445_v63 = vand.u32 2147483647, %v413_v7  ;;  %v446_v20 = vand.u32 2147483647, %v414_v8  ;;  %v1422_v9 = vpop.permute.xlu0 %688  ;;  %v118_v21 = vpop.permute.xlu1 %117  ;;  %v538_v7 = vrot.slane %v1167_v36, 1 }
  0xe1   :  { %v561_v8 = vsel %vm549_vm0, %v534_v4, %v536_v16  ;;  %v558_v61 = vsel %vm549_vm0, %v535_v45, %v537_v6 }
  0xe2   :  { %v1424_v3 = vadd.f32 %v473_v15, %v445_v63  ;;  %v1426_v34 = vadd.f32 %v474_v56, %v446_v20  ;;  %v539_v63 = vrot.slane %v1188_v46, 1  ;;  %v540_v20 = vrot.slane %v1206_v52, 1 }
  0xe3   :  { %v602_v42 = vsub.f32 %v558_v61, %v1148_v32  ;;  %v546_v61 = vrot.slane %v1310_v22, 1 }
  0xe4   :  { %v150_v59 = vpop.permute.xlu0 %149  ;;  %v1428_v62 = vpop.permute.xlu1 %318 }
  0xe5   :  { %v177_v47 = vsel %vm169_vm2, %v118_v21, %v150_v59  ;;  %v193_v48 = vsel %vm169_vm2, %v150_v59, %v118_v21  ;;  %v541_v21 = vrot.slane %v1236_v25, 1  ;;  %v542_v59 = vrot.slane %v1238_v31, 1 }
  0xe6   :  { %v216_v55 = vsub.f32 %v177_v47, %v1105_v23  ;;  %v217_v57 = vsub.f32 %v193_v48, %v1107_v24  ;;  %v544_v47 = vrot.slane %v1281_v49, 1  ;;  %v598_v48 = vsub.f32 %v562_v40, %v1118_v26 }
  0xe7   :  { %v556_v40 = vsel %vm549_vm0, %v537_v6, %v539_v63  ;;  %v554_v43 = vsel %vm549_vm0, %v539_v63, %v541_v21 }
  0xe8   :  { %v248_v0 = vand.u32 2147483647, %v216_v55  ;;  %v249_v14 = vand.u32 2147483647, %v217_v57  ;;  %v1436_v10 = vpop.permute.xlu0 %350  ;;  %v1438_v17 = vpop.permute.xlu1 %693  ;;  %v604_v63 = vsub.f32 %v556_v40, %v1165_v35  ;;  %v551_v40 = vsel %vm549_vm0, %v544_v47, %v546_v61 }
  0xea   :  { %v1440_v19 = vadd.f32 %v276_v1, %v248_v0  ;;  %v1442_v28 = vadd.f32 %v277_v38, %v249_v14  ;;  %v563_v1 = vsel %vm549_vm0, %v532_v60, %v534_v4  ;;  %v560_v38 = vsel %vm549_vm0, %v533_v53, %v535_v45 }
  0xeb   :  { %v543_v60 = vrot.slane %v1271_v13, 1  ;;  %v599_v55 = vsub.f32 %v563_v1, %v1124_v27  ;;  %v600_v14 = vsub.f32 %v560_v38, %v1135_v29  ;;  %v601_v53 = vsub.f32 %v561_v8, %v1137_v30 }
  0xec   :  { %1804 = vst [vmem:[#allocation16_spill] sm:$0xff] %v1440_v19  ;;  %1805 = vst [vmem:[#allocation17_spill] sm:$0xff] %v1442_v28  ;;  %v1444_v50 = vpop.permute.xlu0 %119  ;;  %v1446_v58 = vpop.permute.xlu1 %151  ;;  %v559_v4 = vsel %vm549_vm0, %v536_v16, %v538_v7  ;;  %v545_v45 = vrot.slane %v1306_v37, 1  ;;  %v557_v1 = vsel %vm549_vm0, %v538_v7, %v540_v20  ;;  %v555_v38 = vsel %vm549_vm0, %v540_v20, %v542_v59 }
  0xed   :  { %v552_v8 = vsel %vm549_vm0, %v541_v21, %v543_v60  ;;  %v553_v16 = vsel %vm549_vm0, %v542_v59, %v544_v47  ;;  %v603_v6 = vsub.f32 %v559_v4, %v1154_v33  ;;  %v605_v28 = vsub.f32 %v557_v1, %v1167_v36 }
  0xee   :  { %v606_v20 = vsub.f32 %v554_v43, %v1188_v46  ;;  %v550_v21 = vsel %vm549_vm0, %v543_v60, %v545_v45  ;;  %v631_v32 = vand.u32 2147483647, %v599_v55  ;;  %v607_v59 = vsub.f32 %v555_v38, %v1206_v52 }
  0xef   :  { %v609_v4 = vsub.f32 %v553_v16, %v1238_v31  ;;  %v632_v33 = vand.u32 2147483647, %v600_v14  ;;  %v1528_v19 = vand.u32 2147483647, %v602_v42  ;;  %v1532_v1 = vand.u32 2147483647, %v603_v6 }
  0xf0   :  { %v1448_v51 = vpop.permute.xlu0 %320  ;;  %v1450_v54 = vpop.permute.xlu1 %352  ;;  %v610_v60 = vsub.f32 %v550_v21, %v1271_v13  ;;  %v1809_v55 = vrot.slane %v1011_v5, 1  ;;  %v1810_v14 = vrot.slane %v1000_v2, 1  ;;  %v375_v47 = vsel %vm366_vm1, %v1428_v62, %v1436_v10 }
  0xf1   :  { %v1555_v16 = vand.u32 2147483647, %v606_v20  ;;  %v1557_v5 = vand.u32 2147483647, %v607_v59  ;;  %v611_v2 = vsub.f32 %v551_v40, %v1281_v49  ;;  %v415_v21 = vsub.f32 %v375_v47, %v1118_v26 }
  0xf2   :  { %v581_v38 = vsel %vm549_vm0, %v546_v61, %v1809_v55  ;;  %v580_v42 = vsel %vm549_vm0, %v545_v45, %v1810_v14  ;;  %v1561_v61 = vand.u32 2147483647, %v609_v4  ;;  %v391_v45 = vsel %vm366_vm1, %v1436_v10, %v1428_v62 }
  0xf3   :  { %v612_v20 = vsub.f32 %v580_v42, %v1306_v37  ;;  %v194_v59 = vsel %vm169_vm2, %v1446_v58, %v1444_v50  ;;  %v1583_v62 = vand.u32 2147483647, %v610_v60  ;;  %v743_v55 = vmul.f32 %v1422_v9, %v631_v32 }
  0xf4   :  { %v1452_v23 = vpop.permute.xlu0 %698  ;;  %v1454_v24 = vpop.permute.xlu1 %121  ;;  %v416_v60 = vsub.f32 %v391_v45, %v1124_v27  ;;  %v392_v32 = vsel %vm366_vm1, %v1450_v54, %v1448_v51  ;;  %v219_v42 = vsub.f32 %v194_v59, %v1124_v27 }
  0xf5   :  { %1806 = vst [vmem:[#allocation18_spill] sm:$0xff] %v1452_v23  ;;  %v1608_v10 = vand.u32 2147483647, %v612_v20  ;;  %v773_v27 = vadd.f32 %v1408_v18, %v743_v55 }
  0xf6   :  { %v251_v18 = vand.u32 2147483647, %v219_v42 }
  0xf8   :  { %v1456_v15 = vpop.permute.xlu0 %153  ;;  %v1458_v56 = vpop.permute.xlu1 %322 }
  0xfc   :  { %v1465_v12 = vpop.permute.xlu0 %354  ;;  %v1467_v44 = vpop.permute.xlu1 %703 }
  0xfd   :  { %1807 = vst [vmem:[#allocation19_spill] sm:$0xff] %v1467_v44  ;;  %v630_v44 = vand.u32 2147483647, %v598_v48  ;;  %v608_v48 = vsub.f32 %v552_v8, %v1236_v25  ;;  %v1553_v8 = vand.u32 2147483647, %v605_v28  ;;  %v178_v28 = vsel %vm169_vm2, %v1444_v50, %v1446_v58 }
  0xfe   :  { %v811_v50 = vld [vmem:[%s1784_s2] sm:$0x3]  ;;  %v218_v14 = vsub.f32 %v178_v28, %v1118_v26  ;;  %v447_v58 = vand.u32 2147483647, %v415_v21  ;;  %v179_v21 = vsel %vm169_vm2, %v1454_v24, %v1456_v15  ;;  %v393_v55 = vsel %vm366_vm1, %v1465_v12, %v1458_v56 }
  0xff   :  { %v1559_v6 = vand.u32 2147483647, %v608_v48  ;;  %v742_v40 = vmul.f32 %v1422_v9, %v630_v44  ;;  %v1602_v9 = vand.u32 2147483647, %v611_v2  ;;  %v744_v44 = vmul.f32 %v1438_v17, %v632_v33 }
 0x100   :  { %v1492_v57 = vpop.permute.xlu0 %123  ;;  %v1494_v0 = vpop.permute.xlu1 %155  ;;  %v418_v2 = vsub.f32 %v392_v32, %v1137_v30 }
 0x101   :  { %v772_v33 = vadd.f32 %v1406_v11, %v742_v40  ;;  %v195_v11 = vsel %vm169_vm2, %v1456_v15, %v1454_v24  ;;  %v377_v40 = vsel %vm366_vm1, %v1458_v56, %v1465_v12  ;;  %v180_v24 = vsel %vm169_vm2, %v1492_v57, %v1494_v0  ;;  %v1814_v12 = vld [vmem:[#allocation16_spill] sm:$0xff] }
 0x102   :  { %v450_v32 = vand.u32 2147483647, %v418_v2  ;;  %v221_v42 = vsub.f32 %v195_v11, %v1137_v30  ;;  %v1818_v2 = vld [vmem:[#allocation18_spill] sm:$0xff] }
 0x103   :  { %v774_v59 = vadd.f32 %v772_v33, %v744_v44  ;;  %v220_v44 = vsub.f32 %v179_v21, %v1135_v29  ;;  %v747_v30 = vmul.f32 %v1818_v2, %v1532_v1 }
 0x104   :  { %v1516_v23 = vpop.permute.xlu0 %324  ;;  %v1518_v7 = vpop.permute.xlu1 %356 }
 0x105   :  { %1808 = vst [vmem:[#allocation20_spill] sm:$0xff] %v1516_v23  ;;  %v633_v23 = vand.u32 2147483647, %v601_v53  ;;  %v1551_v53 = vand.u32 2147483647, %v604_v63  ;;  %v613_v63 = vsub.f32 %v581_v38, %v1310_v22  ;;  %v376_v38 = vsel %vm366_vm1, %v1448_v51, %v1450_v54 }
 0x106   :  { %v417_v26 = vsub.f32 %v376_v38, %v1135_v29  ;;  %v1811_v51 = vsub.s32 0, %v1176_v39  ;;  %v477_v38 = vadd.f32 %v1424_v3, %v447_v58  ;;  %v196_v3 = vsel %vm169_vm2, %v1494_v0, %v1492_v57 }
 0x107   :  { %v1606_v47 = vand.u32 2147483647, %v613_v63  ;;  %v745_v45 = vmul.f32 %v1438_v17, %v633_v23  ;;  %v1812_v63 = vsub.s32 1, %v1176_v39  ;;  %v448_v17 = vand.u32 2147483647, %v416_v60 }
 0x108   :  { %v1534_v43 = vpop.permute.xlu0 %708  ;;  %v1536_v46 = vpop.permute.xlu1 %125  ;;  %v1618_v54 = vrot.slane %v811_v50, %v1811_v51  ;;  %v250_v23 = vand.u32 2147483647, %v218_v14  ;;  %v449_v60 = vand.u32 2147483647, %v417_v26  ;;  %v1816_v51 = vld [vmem:[#allocation13_spill] sm:$0xff]  ;;  %v746_v29 = vmul.f32 %v1818_v2, %v1528_v19 }
 0x109   :  { %v1625_v20 = vrot.slane %v811_v50, %v1812_v63  ;;  %v775_v50 = vadd.f32 %v773_v27, %v745_v45  ;;  %v478_v56 = vadd.f32 %v1426_v34, %v448_v17  ;;  %v1815_v45 = vld [vmem:[#allocation12_spill] sm:$0xff]  ;;  %v420_v33 = vsub.f32 %v393_v55, %v1816_v51  ;;  %v1817_v27 = vld [vmem:[#allocation17_spill] sm:$0xff] }
 0x10a   :  { %v280_v58 = vadd.f32 %v1814_v12, %v250_v23  ;;  %v419_v26 = vsub.f32 %v377_v40, %v1815_v45  ;;  %v281_v63 = vadd.f32 %v1817_v27, %v251_v18  ;;  %v222_v21 = vsub.f32 %v180_v24, %v1815_v45  ;;  %v1820_v12 = vld [vmem:[#allocation19_spill] sm:$0xff] }
 0x10b   :  { %1813 = vst [vmem:[#allocation21_spill] sm:$0xff] %v1625_v20  ;;  %v223_v57 = vsub.f32 %v196_v3, %v1816_v51  ;;  %v479_v11 = vadd.f32 %v477_v38, %v449_v60  ;;  %v480_v18 = vadd.f32 %v478_v56, %v450_v32  ;;  %v252_v40 = vand.u32 2147483647, %v220_v44 }
 0x10c   :  { %v1579_v48 = vpop.permute.xlu0 %157  ;;  %v1581_v4 = vpop.permute.xlu1 %326  ;;  %v1819_v34 = vld [vmem:[#allocation20_spill] sm:$0xff]  ;;  %v253_v55 = vand.u32 2147483647, %v221_v42  ;;  %v451_v24 = vand.u32 2147483647, %v419_v26  ;;  %v748_v45 = vmul.f32 %v1820_v12, %v1551_v53  ;;  %v749_v51 = vmul.f32 %v1820_v12, %v1553_v8 }
 0x10d   :  { %v378_v0 = vsel %vm366_vm1, %v1819_v34, %v1518_v7  ;;  %v394_v17 = vsel %vm366_vm1, %v1518_v7, %v1819_v34  ;;  %v181_v19 = vsel %vm169_vm2, %v1536_v46, %v1579_v48  ;;  %v452_v3 = vand.u32 2147483647, %v420_v33 }
 0x10e   :  { %v776_v7 = vadd.f32 %v774_v59, %v746_v29  ;;  %v421_v27 = vsub.f32 %v378_v0, %v1165_v35  ;;  %v422_v2 = vsub.f32 %v394_v17, %v1167_v36  ;;  %v224_v34 = vsub.f32 %v181_v19, %v1165_v35 }
 0x10f   :  { %v777_v20 = vadd.f32 %v775_v50, %v747_v30  ;;  %v254_v38 = vand.u32 2147483647, %v222_v21  ;;  %v255_v60 = vand.u32 2147483647, %v223_v57  ;;  %v197_v32 = vsel %vm169_vm2, %v1579_v48, %v1536_v46 }
 0x110   :  { %v1612_v28 = vpop.permute.xlu0 %358  ;;  %v1614_v22 = vpop.permute.xlu1 %713  ;;  %v282_v42 = vadd.f32 %v280_v58, %v252_v40  ;;  %v283_v56 = vadd.f32 %v281_v63, %v253_v55  ;;  %v750_v8 = vmul.f32 %v1534_v43, %v1555_v16  ;;  %v751_v59 = vmul.f32 %v1534_v43, %v1557_v5  ;;  %v1821_v55 = vld [vmem:[#allocation14_spill] sm:$0xff] }
 0x111   :  { %v481_v26 = vadd.f32 %v479_v11, %v451_v24  ;;  %v482_v35 = vadd.f32 %v480_v18, %v452_v3  ;;  %v778_v50 = vadd.f32 %v776_v7, %v748_v45  ;;  %v779_v33 = vadd.f32 %v777_v20, %v749_v51 }
 0x112   :  { %v453_v29 = vand.u32 2147483647, %v421_v27  ;;  %v454_v30 = vand.u32 2147483647, %v422_v2  ;;  %v225_v21 = vsub.f32 %v197_v32, %v1167_v36  ;;  %v256_v57 = vand.u32 2147483647, %v224_v34 }
 0x113   :  { %v284_v46 = vadd.f32 %v282_v42, %v254_v38  ;;  %v285_v48 = vadd.f32 %v283_v56, %v255_v60  ;;  %v752_v58 = vmul.f32 %v1614_v22, %v1559_v6  ;;  %v753_v16 = vmul.f32 %v1614_v22, %v1561_v61  ;;  %v1825_v41 = vld [vmem:[#allocation21_spill] sm:$0xff] }
 0x114   :  { %v1648_v15 = vpop.permute.xlu0 %127  ;;  %v1650_v14 = vpop.permute.xlu1 %159  ;;  %v780_v43 = vadd.f32 %v778_v50, %v750_v8  ;;  %v781_v5 = vadd.f32 %v779_v33, %v751_v59  ;;  %v379_v20 = vsel %vm366_vm1, %v1581_v4, %v1612_v28  ;;  %v395_v36 = vsel %vm366_vm1, %v1612_v28, %v1581_v4 }
 0x115   :  { %v483_v19 = vadd.f32 %v481_v26, %v453_v29  ;;  %v484_v11 = vadd.f32 %v482_v35, %v454_v30  ;;  %v257_v18 = vand.u32 2147483647, %v225_v21  ;;  %v286_v40 = vadd.f32 %v284_v46, %v256_v57 }
 0x116   :  { %v423_v24 = vsub.f32 %v379_v20, %v1821_v55  ;;  %v424_v3 = vsub.f32 %v395_v36, %v1206_v52  ;;  %v782_v12 = vadd.f32 %v780_v43, %v752_v58  ;;  %v783_v4 = vadd.f32 %v781_v5, %v753_v16 }
 0x117   :  { %v287_v29 = vadd.f32 %v285_v48, %v257_v18 }
 0x118   :  { %v329_v1 = vpop.permute.xlu0 %328  ;;  %v361_v23 = vpop.permute.xlu1 %360  ;;  %v455_v60 = vand.u32 2147483647, %v423_v24  ;;  %v456_v32 = vand.u32 2147483647, %v424_v3 }
 0x119   :  { %v380_v6 = vsel %vm366_vm1, %v329_v1, %v361_v23  ;;  %v396_v22 = vsel %vm366_vm1, %v361_v23, %v329_v1  ;;  %v182_v1 = vsel %vm169_vm2, %v1648_v15, %v1650_v14 }
 0x11a   :  { %v426_v23 = vsub.f32 %v396_v22, %v1238_v31 }
 0x11c   :  { %v719_v44 = vpop.permute.xlu0 %718  ;;  %v130_v53 = vpop.permute.xlu1 %129  ;;  %v458_v30 = vand.u32 2147483647, %v426_v23 }
 0x11d   :  { %v754_v61 = vmul.f32 %v719_v44, %v1583_v62  ;;  %v755_v17 = vmul.f32 %v719_v44, %v1602_v9  ;;  %v198_v62 = vsel %vm169_vm2, %v1650_v14, %v1648_v15  ;;  %v425_v9 = vsub.f32 %v380_v6, %v1236_v25 }
 0x11e   :  { %v226_v44 = vsub.f32 %v182_v1, %v1821_v55  ;;  %v227_v42 = vsub.f32 %v198_v62, %v1206_v52  ;;  %v837_v62 = vld [vmem:[%s1785_s3] sm:$0x3] }
 0x11f   :  { %v784_v51 = vadd.f32 %v782_v12, %v754_v61  ;;  %v785_v7 = vadd.f32 %v783_v4, %v755_v17  ;;  %v457_v52 = vand.u32 2147483647, %v425_v9 }
 0x120   :  { %v162_v63 = vpop.permute.xlu0 %161  ;;  %v331_v0 = vpop.permute.xlu1 %330  ;;  %v258_v57 = vand.u32 2147483647, %v226_v44  ;;  %v259_v46 = vand.u32 2147483647, %v227_v42 }
 0x121   :  { %v183_v34 = vsel %vm169_vm2, %v130_v53, %v162_v63  ;;  %v199_v38 = vsel %vm169_vm2, %v162_v63, %v130_v53 }
 0x122   :  { %v228_v53 = vsub.f32 %v183_v34, %v1236_v25  ;;  %v485_v25 = vadd.f32 %v483_v19, %v455_v60  ;;  %v288_v19 = vadd.f32 %v286_v40, %v258_v57  ;;  %v1824_v60 = vsub.s32 1, %v1176_v39 }
 0x124   :  { %v363_v28 = vpop.permute.xlu0 %362  ;;  %v724_v45 = vpop.permute.xlu1 %723  ;;  %v260_v20 = vand.u32 2147483647, %v228_v53  ;;  %v487_v22 = vadd.f32 %v485_v25, %v457_v52 }
 0x125   :  { %v381_v27 = vsel %vm366_vm1, %v331_v0, %v363_v28  ;;  %v397_v2 = vsel %vm366_vm1, %v363_v28, %v331_v0  ;;  %v756_v15 = vmul.f32 %v724_v45, %v1608_v10  ;;  %v757_v14 = vmul.f32 %v724_v45, %v1606_v47 }
 0x126   :  { %v427_v8 = vsub.f32 %v381_v27, %v1271_v13  ;;  %v428_v59 = vsub.f32 %v397_v2, %v1281_v49  ;;  %v229_v10 = vsub.f32 %v199_v38, %v1238_v31  ;;  %v486_v0 = vadd.f32 %v484_v11, %v456_v32 }
 0x127   :  { %v786_v35 = vadd.f32 %v784_v51, %v756_v15  ;;  %v787_v50 = vadd.f32 %v785_v7, %v757_v14  ;;  %v289_v11 = vadd.f32 %v287_v29, %v259_v46  ;;  %v290_v9 = vadd.f32 %v288_v19, %v260_v20 }
 0x128   :  { %v132_v56 = vpop.permute.xlu0 %131  ;;  %v164_v26 = vpop.permute.xlu1 %163  ;;  %v459_v31 = vand.u32 2147483647, %v427_v8  ;;  %v460_v43 = vand.u32 2147483647, %v428_v59  ;;  %v261_v36 = vand.u32 2147483647, %v229_v10  ;;  %v488_v61 = vadd.f32 %v486_v0, %v458_v30 }
 0x129   :  { %v184_v47 = vsel %vm169_vm2, %v132_v56, %v164_v26  ;;  %v200_v33 = vsel %vm169_vm2, %v164_v26, %v132_v56  ;;  %v799_v21 = vadd.f32 %v787_v50, %v786_v35  ;;  %v1823_v15 = vsub.s32 0, %v1176_v39 }
 0x12a   :  { %v230_v58 = vsub.f32 %v184_v47, %v1271_v13  ;;  %v231_v16 = vsub.f32 %v200_v33, %v1281_v49  ;;  %v1822_v49 = vld [vmem:[#allocation15_spill] sm:$0xff]  ;;  %v489_v3 = vadd.f32 %v487_v22, %v459_v31  ;;  %v490_v12 = vadd.f32 %v488_v61, %v460_v43 }
 0x12b   :  { %800 = vadd.xlane.f32.xlu0 %v799_v21  ;;  %v291_v23 = vadd.f32 %v289_v11, %v261_v36  ;;  %v842_v14 = vrot.slane %v837_v62, %v1823_v15  ;;  %v846_v32 = vrot.slane %v837_v62, %v1824_v60 }
 0x12c   :  { %v333_v63 = vpop.permute.xlu0 %332  ;;  %v365_v5 = vpop.permute.xlu1 %364  ;;  %v262_v18 = vand.u32 2147483647, %v230_v58  ;;  %v263_v55 = vand.u32 2147483647, %v231_v16 }
 0x12d   :  { %v382_v48 = vsel %vm366_vm1, %v333_v63, %v365_v5  ;;  %v398_v6 = vsel %vm366_vm1, %v365_v5, %v333_v63 }
 0x12e   :  { %v429_v13 = vsub.f32 %v382_v48, %v1306_v37  ;;  %v430_v17 = vsub.f32 %v398_v6, %v1822_v49  ;;  %v292_v34 = vadd.f32 %v290_v9, %v262_v18  ;;  %v293_v38 = vadd.f32 %v291_v23, %v263_v55 }
 0x130   :  { %v134_v24 = vpop.permute.xlu0 %133  ;;  %v461_v4 = vand.u32 2147483647, %v429_v13  ;;  %v462_v28 = vand.u32 2147483647, %v430_v17  ;;  %v166_v1 = vpop.permute.xlu1 %165 }
 0x131   :  { %v185_v45 = vsel %vm169_vm2, %v134_v24, %v166_v1  ;;  %v201_v40 = vsel %vm169_vm2, %v166_v1, %v134_v24 }
 0x132   :  { %v491_v51 = vadd.f32 %v489_v3, %v461_v4  ;;  %v492_v7 = vadd.f32 %v490_v12, %v462_v28  ;;  %v232_v27 = vsub.f32 %v185_v45, %v1306_v37  ;;  %v233_v2 = vsub.f32 %v201_v40, %v1822_v49 }
 0x134   :  { %v264_v44 = vand.u32 2147483647, %v232_v27  ;;  %v265_v42 = vand.u32 2147483647, %v233_v2  ;;  %v823_v56 = vmul.f32 %v1618_v54, %v491_v51  ;;  %v824_v8 = vmul.f32 %v1825_v41, %v492_v7 }
 0x136   :  { %v294_v59 = vadd.f32 %v292_v34, %v264_v44  ;;  %v295_v26 = vadd.f32 %v293_v38, %v265_v42  ;;  %v825_v35 = vadd.f32 %v824_v8, %v823_v56 }
 0x138   :  { %826 = vadd.xlane.f32.xlu1 %v825_v35  ;;  %v849_v37 = vmul.f32 %v842_v14, %v294_v59  ;;  %v850_v50 = vmul.f32 %v846_v32, %v295_v26 }
 0x13a   :  { %v851_v53 = vadd.f32 %v850_v50, %v849_v37 }
 0x13c   :  { %852 = vadd.xlane.f32.xlu0 %v851_v53 }
 0x1b8   :  { %v801_v10 = vpop.xlane.xlu0 %800 }
 0x1b9   :  { %v802_v47 = vrot.slane %v801_v10, 4 }
 0x1bb   :  { %v803_v33 = vadd.f32 %v802_v47, %v801_v10 }
 0x1bd   :  { %v804_v29 = vrot.slane %v803_v33, 2 }
 0x1bf   :  { %v805_v39 = vadd.f32 %v804_v29, %v803_v33 }
 0x1c1   :  { %v806_v52 = vrot.slane %v805_v39, 1 }
 0x1c3   :  { %v807_v30 = vadd.f32 %v806_v52, %v805_v39 }
 0x1c5   :  { %v827_v21 = vpop.xlane.xlu1 %826  ;;  %890 = vpush %v807_v30 }
 0x1c6   :  { %v828_v57 = vrot.slane %v827_v21, 4 }
 0x1c8   :  { %v829_v54 = vadd.f32 %v828_v57, %v827_v21 }
 0x1c9   :  { %v853_v46 = vpop.xlane.xlu0 %852 }
 0x1ca   :  { %v830_v58 = vrot.slane %v829_v54, 2  ;;  %v854_v16 = vrot.slane %v853_v46, 4 }
 0x1cc   :  { %v831_v63 = vadd.f32 %v830_v58, %v829_v54  ;;  %v855_v25 = vadd.f32 %v854_v16, %v853_v46 }
 0x1ce   :  { %v856_v0 = vrot.slane %v855_v25, 2  ;;  %v832_v31 = vrot.slane %v831_v63, 1 }
 0x1d0   :  { %v857_v43 = vadd.f32 %v856_v0, %v855_v25  ;;  %v833_v5 = vadd.f32 %v832_v31, %v831_v63 }
 0x1d2   :  { %892 = vpush %v833_v5  ;;  %v858_v20 = vrot.slane %v857_v43, 1 }
 0x1d4   :  { %v859_v36 = vadd.f32 %v858_v20, %v857_v43 }
 0x1d6   :  { %894 = vpush %v859_v36 }
 0x1f6   :  { %s891_s3 = spop %890 }
 0x1f7   :  { %s861_s13 = smul.f32 3.2552085e-05, %s891_s3 }
 0x203   :  { %s893_s11 = spop %892 }
 0x204   :  { %s862_s12 = smul.f32 3.2552085e-05, %s893_s11 }
 0x206   :  { %s863_s17 = sadd.f32 %s862_s12, %s861_s13 }
 0x207   :  { %s895_s14 = spop %894 }
 0x208   :  { %s864_s18 = smul.f32 3.2552085e-05, %s895_s14 }
 0x20a   :  { %s865_s19 = sadd.f32 %s864_s18, %s863_s17 }
 0x20c   :  { %v866_v48 = vstv %s865_s19 }
 0x20d   :  { %868 = vst.msk [vmem:[#allocation9] sm:$0x1] %vm867_vm3, %v866_v48 }
 0x20e   :  { %938 = shalt.err (!%p935_p12)
}
 0x20f   :  { %s939_s24 = scalar_lea.hbm %s1786_s4, 16 }
 0x210   :  { %p940_p13 = scmp.ne.s32.totalorder %s1786_s4, %s939_s24  ;;  %p943_p0 = scmp.lt.u32.totalorder %s939_s24, %s1786_s4 }
 0x212   :  { %p945_p1 = pnand %p943_p0, %p940_p13 }
 0x214   :  { %948 = shalt.err (!%p945_p1)
}
 0x215   :  { %878 = dma.vmem_to_hbm [thread:$0]  %s876_s16, 16, %s1786_s4, [#allocation8]  }
 0x216   :  { %951 = dma.done.wait [#allocation8], 16  }
 0x217   :  { %952 = vsyncadd [#allocation8], 4294967280 }
 0x218   :  { %882 = vsyncpa [#allocation7], 1 }
 0x219   :  { %883 = vsyncpa [#allocation8], 1 }

</bundles_post_ra>
